<compile_context>
chip_gen: v5e
topology: v5e:2x2
jax: 0.10.0
libtpu: 0.0.40
codegen_flags: <defaults>
</compile_context>

<pallas_src>
import math
import functools

import jax
import jax.numpy as jnp
from jax.experimental import pallas as pl
from jax.experimental.pallas import tpu as pltpu  # noqa: F401  (TPU backend)

SQRT_2_OVER_PI = math.sqrt(2.0 / math.pi)
LN_EPS = 1e-5                                   # torch.nn.LayerNorm default
NEG_FILL = float(jnp.finfo(jnp.float32).min)    # torch.finfo().min


def _gelu(x):
    # BERT tanh-approximation GELU, exactly as in the PyTorch module.
    return 0.5 * x * (1.0 + jnp.tanh(SQRT_2_OVER_PI * (x + 0.044715 * x * x * x)))


def _layer_norm(x, w, b):
    mean = jnp.mean(x, axis=-1, keepdims=True)
    var = jnp.mean((x - mean) ** 2, axis=-1, keepdims=True)
    return (x - mean) * jax.lax.rsqrt(var + LN_EPS) * w + b


# --------------------------------------------------------------------------- #
# Fused SelfAttentionLayer kernel (single invocation, all batches at once)
# --------------------------------------------------------------------------- #
def self_attention_layer_kernel(
        values_ref, orig_ref, mask_ref,
        iq_ref, im_ref, ipa_ref,
        wq_ref, bq_ref, wk_ref, bk_ref, wv_ref, bv_ref,
        wc_ref, bc_ref, lnw_ref, lnb_ref,
        wf1_ref, bf1_ref, wf2_ref, bf2_ref,
        out_ref, weight_ref,
        *, num_heads, head_dim):
    B, N, H = values_ref.shape
    nh, hd = num_heads, head_dim
    scale = 1.0 / math.sqrt(hd)

    # Inputs plus learned per-individual offsets, flattened to (B*N, H) rows.
    itq = (values_ref[...] + iq_ref[...]).reshape(B * N, H)   # query input
    itm = (orig_ref[...] + im_ref[...]).reshape(B * N, H)     # memory input

    # Full-width QKV projections: one MXU matmul each (no per-head dots).
    q = jnp.dot(itq, wq_ref[...], preferred_element_type=jnp.float32) + bq_ref[...]
    k = jnp.dot(itm, wk_ref[...], preferred_element_type=jnp.float32) + bk_ref[...]
    v = jnp.dot(itm, wv_ref[...], preferred_element_type=jnp.float32) + bv_ref[...]

    # Split heads: (B*N, H) -> (nh*B, N, hd) so all (head, batch) pairs are
    # processed by one batched einsum.
    def split_heads(t):
        t3 = t.reshape(B, N, H)
        return jnp.stack(
            [t3[:, :, h * hd:(h + 1) * hd] for h in range(nh)], axis=0
        ).reshape(nh * B, N, hd)

    qh = split_heads(q)
    kh = split_heads(k)
    vh = split_heads(v)

    # Scores for all heads/batches at once; contraction instead of explicit .T.
    s = jnp.einsum('gqd,gkd->gqk', qh, kh,
                   preferred_element_type=jnp.float32) * scale
    s = jnp.where(mask_ref[...] > 0.5, NEG_FILL, s)          # mask (N, N) broadcast
    s = s - jnp.max(s, axis=-1, keepdims=True)               # numerically stable
    e = jnp.exp(s)
    w = e / jnp.sum(e, axis=-1, keepdims=True)               # softmax(dim=-1)

    # Single bulk store of all attention weights (no per-head partial stores).
    weight_ref[...] = w.reshape(nh, B, N, N)

    attn = jnp.einsum('gqk,gkd->gqd', w, vh,
                      preferred_element_type=jnp.float32)    # (nh*B, N, hd)

    # Combine heads folded into a batched contraction against wc (nh, hd, H):
    # comb = sum_h attn_h @ wc_h   (no lane-concat of head fragments).
    attn_r = attn.reshape(nh, B * N, hd)
    comb = jnp.einsum('hnd,hdo->hno', attn_r, wc_ref[...],
                      preferred_element_type=jnp.float32).sum(axis=0) + bc_ref[...]

    # Post-attention residual + shared LayerNorm.
    pre = (comb.reshape(B, N, H) + ipa_ref[...]).reshape(B * N, H)
    a_ln = _layer_norm(pre, lnw_ref[...], lnb_ref[...])

    # Feed-forward MLP (Linear -> GELU -> Linear).
    ff = _gelu(jnp.dot(a_ln, wf1_ref[...],
                       preferred_element_type=jnp.float32) + bf1_ref[...])
    ff = jnp.dot(ff, wf2_ref[...],
                 preferred_element_type=jnp.float32) + bf2_ref[...]

    # Second residual + SAME LayerNorm parameters (as in the PyTorch module).
    out = _layer_norm(a_ln + ff, lnw_ref[...], lnb_ref[...])
    out_ref[...] = out.reshape(B, N, H)


@functools.partial(jax.jit, static_argnames=("num_heads",))
def self_attention_layer(values, original_input, mask, p, *, num_heads):
    """One SelfAttentionLayer forward. Returns (new_values, attention_weights)."""
    B, N, H = values.shape
    head_dim = H // num_heads
    kernel = functools.partial(self_attention_layer_kernel,
                               num_heads=num_heads, head_dim=head_dim)

    # Per-head blocks of the combine-heads weight, reshaped once outside.
    wc3 = p["wc"].reshape(num_heads, head_dim, H)
    mask_f = mask.astype(jnp.float32)                         # 1.0 == masked

    out, w_hb = pl.pallas_call(
        kernel,
        out_shape=(
            jax.ShapeDtypeStruct((B, N, H), jnp.float32),
            jax.ShapeDtypeStruct((num_heads, B, N, N), jnp.float32),
        ),
        # No grid / specs: whole-array blocks in VMEM, single invocation.
    )(values, original_input, mask_f,
      p["iq"], p["im"], p["ipa"],
      p["wq"], p["bq"], p["wk"], p["bk"], p["wv"], p["bv"],
      wc3, p["bc"], p["ln_w"], p["ln_b"],
      p["wf1"], p["bf1"], p["wf2"], p["bf2"])

    weight = jnp.transpose(w_hb, (1, 0, 2, 3))                # (B, heads, N, N)
    return out, weight


def self_attention_layer_forward(input_as_dict, params, num_heads):
    """Dict-style wrapper mirroring the PyTorch forward signature."""
    new_values, weight = self_attention_layer(
        input_as_dict["values"], input_as_dict["original_input"],
        input_as_dict["mask"], params, num_heads=num_heads)
    input_as_dict = dict(input_as_dict)
    input_as_dict["values"] = new_values
    input_as_dict["weights"] = list(input_as_dict["weights"]) + [weight]
    return input_as_dict


# --------------------------------------------------------------------------- #
# Deterministic synthetic parameter initialization
#   - per-head Q/K/V Linear weights are stored stacked head-major along the
#     output columns of a single (H, H) matrix (x @ W + b layout).
# --------------------------------------------------------------------------- #
def init_params(key, hidden_size, num_individuals):
    H = hidden_size
    ks = iter(jax.random.split(key, 24))
    nrm = lambda shape, s=0.1: (s * jax.random.normal(next(ks), shape)).astype(jnp.float32)
    return {
        "iq": nrm((num_individuals, H), 1.0),   # individual_query (torch.randn)
        "im": nrm((num_individuals, H), 1.0),   # individual_memory
        "ipa": nrm((num_individuals, H), 1.0),  # individual_post_attention
        "wq": nrm((H, H)), "bq": nrm((1, H)),
        "wk": nrm((H, H)), "bk": nrm((1, H)),
        "wv": nrm((H, H)), "bv": nrm((1, H)),
        "wc": nrm((H, H)), "bc": nrm((1, H)),   # linear_combine_heads
        "ln_w": jnp.ones((1, H), jnp.float32),  # shared LayerNorm
        "ln_b": jnp.zeros((1, H), jnp.float32),
        "wf1": nrm((H, H)), "bf1": nrm((1, H)), # top_feedfoward MLP
        "wf2": nrm((H, H)), "bf2": nrm((1, H)),
    }


# --------------------------------------------------------------------------- #
if __name__ == "__main__":
    B, N = 2, 8                 # batch, num_individuals
    HIDDEN_SIZE = 32
    NUM_HEADS = 4               # head_dim = 8

    key = jax.random.PRNGKey(0)
    k_v, k_o, k_p = jax.random.split(key, 3)
    values_in = jax.random.normal(k_v, (B, N, HIDDEN_SIZE), dtype=jnp.float32)
    original_input = jax.random.normal(k_o, (B, N, HIDDEN_SIZE), dtype=jnp.float32)
    mask = jnp.eye(N, dtype=jnp.bool_)          # forbid self-attention (diagonal)

    params = init_params(k_p, HIDDEN_SIZE, N)

    state = {"values": values_in, "original_input": original_input,
             "mask": mask, "weights": []}
    state = self_attention_layer_forward(state, params, NUM_HEADS)

    values_out = jax.block_until_ready(state["values"])
    weight = jax.block_until_ready(state["weights"][0])

    assert values_out.shape == (B, N, HIDDEN_SIZE)
    assert weight.shape == (B, NUM_HEADS, N, N)
    assert bool(jnp.all(jnp.isfinite(values_out)))
    # diagonal of attention weights must be ~0 (masked) and rows sum to 1
    diag = jnp.diagonal(weight, axis1=-2, axis2=-1)
    assert bool(jnp.all(diag < 1e-6))
    assert bool(jnp.allclose(jnp.sum(weight, axis=-1), 1.0, atol=1e-5))

    print("KERNEL_OK")
</pallas_src>

<mosaic_0001>
module attributes {stable_mosaic.version = 11 : i64} {
  func.func @self_attention_layer_kernel(%arg0: memref<2x8x32xf32, #tpu.memory_space<vmem>>, %arg1: memref<2x8x32xf32, #tpu.memory_space<vmem>>, %arg2: memref<8x8xf32, #tpu.memory_space<vmem>>, %arg3: memref<8x32xf32, #tpu.memory_space<vmem>>, %arg4: memref<8x32xf32, #tpu.memory_space<vmem>>, %arg5: memref<8x32xf32, #tpu.memory_space<vmem>>, %arg6: memref<32x32xf32, #tpu.memory_space<vmem>>, %arg7: memref<1x32xf32, #tpu.memory_space<vmem>>, %arg8: memref<32x32xf32, #tpu.memory_space<vmem>>, %arg9: memref<1x32xf32, #tpu.memory_space<vmem>>, %arg10: memref<32x32xf32, #tpu.memory_space<vmem>>, %arg11: memref<1x32xf32, #tpu.memory_space<vmem>>, %arg12: memref<4x8x32xf32, #tpu.memory_space<vmem>>, %arg13: memref<1x32xf32, #tpu.memory_space<vmem>>, %arg14: memref<1x32xf32, #tpu.memory_space<vmem>>, %arg15: memref<1x32xf32, #tpu.memory_space<vmem>>, %arg16: memref<32x32xf32, #tpu.memory_space<vmem>>, %arg17: memref<1x32xf32, #tpu.memory_space<vmem>>, %arg18: memref<32x32xf32, #tpu.memory_space<vmem>>, %arg19: memref<1x32xf32, #tpu.memory_space<vmem>>, %arg20: memref<2x8x32xf32, #tpu.memory_space<vmem>>, %arg21: memref<4x2x8x8xf32, #tpu.memory_space<vmem>>) attributes {dimension_semantics = [], scalar_prefetch = 0 : i64, scratch_operands = 0 : i64, tpu.core_type = #tpu.core_type<tc>} {
    %c0 = arith.constant 0 : index
    %c0_0 = arith.constant 0 : index
    %c0_1 = arith.constant 0 : index
    %0 = vector.load %arg0[%c0, %c0_0, %c0_1] : memref<2x8x32xf32, #tpu.memory_space<vmem>>, vector<2x8x32xf32>
    %c0_2 = arith.constant 0 : index
    %c0_3 = arith.constant 0 : index
    %1 = vector.load %arg3[%c0_2, %c0_3] : memref<8x32xf32, #tpu.memory_space<vmem>>, vector<8x32xf32>
    %2 = vector.shape_cast %1 : vector<8x32xf32> to vector<1x8x32xf32>
    %3 = vector.broadcast %2 : vector<1x8x32xf32> to vector<2x8x32xf32>
    %4 = arith.addf %0, %3 : vector<2x8x32xf32>
    %5 = vector.shape_cast %4 : vector<2x8x32xf32> to vector<16x32xf32>
    %c0_4 = arith.constant 0 : index
    %c0_5 = arith.constant 0 : index
    %c0_6 = arith.constant 0 : index
    %6 = vector.load %arg1[%c0_4, %c0_5, %c0_6] : memref<2x8x32xf32, #tpu.memory_space<vmem>>, vector<2x8x32xf32>
    %c0_7 = arith.constant 0 : index
    %c0_8 = arith.constant 0 : index
    %7 = vector.load %arg4[%c0_7, %c0_8] : memref<8x32xf32, #tpu.memory_space<vmem>>, vector<8x32xf32>
    %8 = vector.shape_cast %7 : vector<8x32xf32> to vector<1x8x32xf32>
    %9 = vector.broadcast %8 : vector<1x8x32xf32> to vector<2x8x32xf32>
    %10 = arith.addf %6, %9 : vector<2x8x32xf32>
    %11 = vector.shape_cast %10 : vector<2x8x32xf32> to vector<16x32xf32>
    %c0_9 = arith.constant 0 : index
    %c0_10 = arith.constant 0 : index
    %12 = vector.load %arg6[%c0_9, %c0_10] : memref<32x32xf32, #tpu.memory_space<vmem>>, vector<32x32xf32>
    %cst = arith.constant dense<0.000000e+00> : vector<16x32xf32>
    %13 = tpu.matmul %5, %12, %cst {dimension_numbers = #tpu.dot_dimension_numbers<[1], [0], [0], [1], [0, 0, 1, 1], [], []>} : vector<16x32xf32>, vector<32x32xf32>, vector<16x32xf32> -> vector<16x32xf32>
    %c0_11 = arith.constant 0 : index
    %c0_12 = arith.constant 0 : index
    %14 = vector.load %arg7[%c0_11, %c0_12] : memref<1x32xf32, #tpu.memory_space<vmem>>, vector<1x32xf32>
    %15 = vector.broadcast %14 : vector<1x32xf32> to vector<16x32xf32>
    %16 = arith.addf %13, %15 : vector<16x32xf32>
    %c0_13 = arith.constant 0 : index
    %c0_14 = arith.constant 0 : index
    %17 = vector.load %arg8[%c0_13, %c0_14] : memref<32x32xf32, #tpu.memory_space<vmem>>, vector<32x32xf32>
    %cst_15 = arith.constant dense<0.000000e+00> : vector<16x32xf32>
    %18 = tpu.matmul %11, %17, %cst_15 {dimension_numbers = #tpu.dot_dimension_numbers<[1], [0], [0], [1], [0, 0, 1, 1], [], []>} : vector<16x32xf32>, vector<32x32xf32>, vector<16x32xf32> -> vector<16x32xf32>
    %c0_16 = arith.constant 0 : index
    %c0_17 = arith.constant 0 : index
    %19 = vector.load %arg9[%c0_16, %c0_17] : memref<1x32xf32, #tpu.memory_space<vmem>>, vector<1x32xf32>
    %20 = vector.broadcast %19 : vector<1x32xf32> to vector<16x32xf32>
    %21 = arith.addf %18, %20 : vector<16x32xf32>
    %c0_18 = arith.constant 0 : index
    %c0_19 = arith.constant 0 : index
    %22 = vector.load %arg10[%c0_18, %c0_19] : memref<32x32xf32, #tpu.memory_space<vmem>>, vector<32x32xf32>
    %cst_20 = arith.constant dense<0.000000e+00> : vector<16x32xf32>
    %23 = tpu.matmul %11, %22, %cst_20 {dimension_numbers = #tpu.dot_dimension_numbers<[1], [0], [0], [1], [0, 0, 1, 1], [], []>} : vector<16x32xf32>, vector<32x32xf32>, vector<16x32xf32> -> vector<16x32xf32>
    %c0_21 = arith.constant 0 : index
    %c0_22 = arith.constant 0 : index
    %24 = vector.load %arg11[%c0_21, %c0_22] : memref<1x32xf32, #tpu.memory_space<vmem>>, vector<1x32xf32>
    %25 = vector.broadcast %24 : vector<1x32xf32> to vector<16x32xf32>
    %26 = arith.addf %23, %25 : vector<16x32xf32>
    %27 = vector.shape_cast %16 : vector<16x32xf32> to vector<2x8x32xf32>
    %28 = vector.extract_strided_slice %27 {offsets = [0, 0, 0], sizes = [2, 8, 8], strides = [1, 1, 1]} : vector<2x8x32xf32> to vector<2x8x8xf32>
    %29 = vector.extract_strided_slice %27 {offsets = [0, 0, 8], sizes = [2, 8, 8], strides = [1, 1, 1]} : vector<2x8x32xf32> to vector<2x8x8xf32>
    %30 = vector.extract_strided_slice %27 {offsets = [0, 0, 16], sizes = [2, 8, 8], strides = [1, 1, 1]} : vector<2x8x32xf32> to vector<2x8x8xf32>
    %31 = vector.extract_strided_slice %27 {offsets = [0, 0, 24], sizes = [2, 8, 8], strides = [1, 1, 1]} : vector<2x8x32xf32> to vector<2x8x8xf32>
    %32 = vector.shape_cast %28 : vector<2x8x8xf32> to vector<1x2x8x8xf32>
    %33 = vector.shape_cast %29 : vector<2x8x8xf32> to vector<1x2x8x8xf32>
    %34 = vector.shape_cast %30 : vector<2x8x8xf32> to vector<1x2x8x8xf32>
    %35 = vector.shape_cast %31 : vector<2x8x8xf32> to vector<1x2x8x8xf32>
    %36 = tpu.concatenate %32, %33, %34, %35 in 0 : vector<1x2x8x8xf32>, vector<1x2x8x8xf32>, vector<1x2x8x8xf32>, vector<1x2x8x8xf32> -> vector<4x2x8x8xf32>
    %37 = vector.shape_cast %36 : vector<4x2x8x8xf32> to vector<8x8x8xf32>
    %38 = vector.shape_cast %21 : vector<16x32xf32> to vector<2x8x32xf32>
    %39 = vector.extract_strided_slice %38 {offsets = [0, 0, 0], sizes = [2, 8, 8], strides = [1, 1, 1]} : vector<2x8x32xf32> to vector<2x8x8xf32>
    %40 = vector.extract_strided_slice %38 {offsets = [0, 0, 8], sizes = [2, 8, 8], strides = [1, 1, 1]} : vector<2x8x32xf32> to vector<2x8x8xf32>
    %41 = vector.extract_strided_slice %38 {offsets = [0, 0, 16], sizes = [2, 8, 8], strides = [1, 1, 1]} : vector<2x8x32xf32> to vector<2x8x8xf32>
    %42 = vector.extract_strided_slice %38 {offsets = [0, 0, 24], sizes = [2, 8, 8], strides = [1, 1, 1]} : vector<2x8x32xf32> to vector<2x8x8xf32>
    %43 = vector.shape_cast %39 : vector<2x8x8xf32> to vector<1x2x8x8xf32>
    %44 = vector.shape_cast %40 : vector<2x8x8xf32> to vector<1x2x8x8xf32>
    %45 = vector.shape_cast %41 : vector<2x8x8xf32> to vector<1x2x8x8xf32>
    %46 = vector.shape_cast %42 : vector<2x8x8xf32> to vector<1x2x8x8xf32>
    %47 = tpu.concatenate %43, %44, %45, %46 in 0 : vector<1x2x8x8xf32>, vector<1x2x8x8xf32>, vector<1x2x8x8xf32>, vector<1x2x8x8xf32> -> vector<4x2x8x8xf32>
    %48 = vector.shape_cast %47 : vector<4x2x8x8xf32> to vector<8x8x8xf32>
    %49 = vector.shape_cast %26 : vector<16x32xf32> to vector<2x8x32xf32>
    %50 = vector.extract_strided_slice %49 {offsets = [0, 0, 0], sizes = [2, 8, 8], strides = [1, 1, 1]} : vector<2x8x32xf32> to vector<2x8x8xf32>
    %51 = vector.extract_strided_slice %49 {offsets = [0, 0, 8], sizes = [2, 8, 8], strides = [1, 1, 1]} : vector<2x8x32xf32> to vector<2x8x8xf32>
    %52 = vector.extract_strided_slice %49 {offsets = [0, 0, 16], sizes = [2, 8, 8], strides = [1, 1, 1]} : vector<2x8x32xf32> to vector<2x8x8xf32>
    %53 = vector.extract_strided_slice %49 {offsets = [0, 0, 24], sizes = [2, 8, 8], strides = [1, 1, 1]} : vector<2x8x32xf32> to vector<2x8x8xf32>
    %54 = vector.shape_cast %50 : vector<2x8x8xf32> to vector<1x2x8x8xf32>
    %55 = vector.shape_cast %51 : vector<2x8x8xf32> to vector<1x2x8x8xf32>
    %56 = vector.shape_cast %52 : vector<2x8x8xf32> to vector<1x2x8x8xf32>
    %57 = vector.shape_cast %53 : vector<2x8x8xf32> to vector<1x2x8x8xf32>
    %58 = tpu.concatenate %54, %55, %56, %57 in 0 : vector<1x2x8x8xf32>, vector<1x2x8x8xf32>, vector<1x2x8x8xf32>, vector<1x2x8x8xf32> -> vector<4x2x8x8xf32>
    %59 = vector.shape_cast %58 : vector<4x2x8x8xf32> to vector<8x8x8xf32>
    "tpu.trace_start"() <{level = 10 : i32, message = "gqd,gkd->gqk"}> : () -> ()
    %cst_23 = arith.constant dense<0.000000e+00> : vector<8x8x8xf32>
    %60 = tpu.matmul %37, %48, %cst_23 {dimension_numbers = #tpu.dot_dimension_numbers<[2], [2], [1], [1], [0, 0, 0, 1, 1, 1], [0], [0]>} : vector<8x8x8xf32>, vector<8x8x8xf32>, vector<8x8x8xf32> -> vector<8x8x8xf32>
    "tpu.trace_stop"() : () -> ()
    %cst_24 = arith.constant 0.353553385 : f32
    %61 = vector.broadcast %cst_24 : f32 to vector<8x8x8xf32>
    %62 = arith.mulf %60, %61 : vector<8x8x8xf32>
    %c0_25 = arith.constant 0 : index
    %c0_26 = arith.constant 0 : index
    %63 = vector.load %arg2[%c0_25, %c0_26] : memref<8x8xf32, #tpu.memory_space<vmem>>, vector<8x8xf32>
    %cst_27 = arith.constant 5.000000e-01 : f32
    %64 = vector.broadcast %cst_27 : f32 to vector<8x8xf32>
    %65 = arith.cmpf ogt, %63, %64 : vector<8x8xf32>
    %cst_28 = arith.constant -3.40282347E+38 : f32
    %66 = vector.shape_cast %65 : vector<8x8xi1> to vector<1x8x8xi1>
    %67 = vector.broadcast %66 : vector<1x8x8xi1> to vector<8x8x8xi1>
    %68 = vector.broadcast %cst_28 : f32 to vector<8x8x8xf32>
    %69 = arith.select %67, %68, %62 : vector<8x8x8xi1>, vector<8x8x8xf32>
    %cst_29 = arith.constant dense<0xFF800000> : vector<8x8xf32>
    %70 = vector.multi_reduction <maximumf>, %69, %cst_29 [2] : vector<8x8x8xf32> to vector<8x8xf32>
    %71 = vector.shape_cast %70 : vector<8x8xf32> to vector<8x8x1xf32>
    %72 = vector.broadcast %71 : vector<8x8x1xf32> to vector<8x8x8xf32>
    %73 = arith.subf %69, %72 : vector<8x8x8xf32>
    %74 = math.exp %73 : vector<8x8x8xf32>
    %cst_30 = arith.constant dense<0.000000e+00> : vector<8x8xf32>
    %75 = vector.multi_reduction <add>, %74, %cst_30 [2] : vector<8x8x8xf32> to vector<8x8xf32>
    %76 = vector.shape_cast %75 : vector<8x8xf32> to vector<8x8x1xf32>
    %77 = vector.broadcast %76 : vector<8x8x1xf32> to vector<8x8x8xf32>
    %78 = arith.divf %74, %77 : vector<8x8x8xf32>
    %79 = vector.shape_cast %78 : vector<8x8x8xf32> to vector<4x2x8x8xf32>
    %c0_31 = arith.constant 0 : index
    %c0_32 = arith.constant 0 : index
    %c0_33 = arith.constant 0 : index
    %c0_34 = arith.constant 0 : index
    %80 = vector.load %arg21[%c0_31, %c0_32, %c0_33, %c0_34] : memref<4x2x8x8xf32, #tpu.memory_space<vmem>>, vector<4x2x8x8xf32>
    tpu.vector_store %arg21[%c0_31, %c0_32, %c0_33, %c0_34], %79 {strides = array<i32>} : memref<4x2x8x8xf32, #tpu.memory_space<vmem>>, vector<4x2x8x8xf32>,
    "tpu.trace_start"() <{level = 10 : i32, message = "gqk,gkd->gqd"}> : () -> ()
    %cst_35 = arith.constant dense<0.000000e+00> : vector<8x8x8xf32>
    %81 = tpu.matmul %78, %59, %cst_35 {dimension_numbers = #tpu.dot_dimension_numbers<[2], [1], [1], [2], [0, 0, 0, 1, 1, 2], [0], [0]>} : vector<8x8x8xf32>, vector<8x8x8xf32>, vector<8x8x8xf32> -> vector<8x8x8xf32>
    "tpu.trace_stop"() : () -> ()
    %82 = vector.shape_cast %81 : vector<8x8x8xf32> to vector<4x16x8xf32>
    %c0_36 = arith.constant 0 : index
    %c0_37 = arith.constant 0 : index
    %c0_38 = arith.constant 0 : index
    %83 = vector.load %arg12[%c0_36, %c0_37, %c0_38] : memref<4x8x32xf32, #tpu.memory_space<vmem>>, vector<4x8x32xf32>
    "tpu.trace_start"() <{level = 10 : i32, message = "hnd,hdo->hno"}> : () -> ()
    %cst_39 = arith.constant dense<0.000000e+00> : vector<4x16x32xf32>
    %84 = tpu.matmul %82, %83, %cst_39 {dimension_numbers = #tpu.dot_dimension_numbers<[2], [1], [1], [2], [0, 0, 0, 1, 1, 2], [0], [0]>} : vector<4x16x8xf32>, vector<4x8x32xf32>, vector<4x16x32xf32> -> vector<4x16x32xf32>
    "tpu.trace_stop"() : () -> ()
    %cst_40 = arith.constant dense<0.000000e+00> : vector<16x32xf32>
    %85 = vector.multi_reduction <add>, %84, %cst_40 [0] : vector<4x16x32xf32> to vector<16x32xf32>
    %c0_41 = arith.constant 0 : index
    %c0_42 = arith.constant 0 : index
    %86 = vector.load %arg13[%c0_41, %c0_42] : memref<1x32xf32, #tpu.memory_space<vmem>>, vector<1x32xf32>
    %87 = vector.broadcast %86 : vector<1x32xf32> to vector<16x32xf32>
    %88 = arith.addf %85, %87 : vector<16x32xf32>
    %89 = vector.shape_cast %88 : vector<16x32xf32> to vector<2x8x32xf32>
    %c0_43 = arith.constant 0 : index
    %c0_44 = arith.constant 0 : index
    %90 = vector.load %arg5[%c0_43, %c0_44] : memref<8x32xf32, #tpu.memory_space<vmem>>, vector<8x32xf32>
    %91 = vector.shape_cast %90 : vector<8x32xf32> to vector<1x8x32xf32>
    %92 = vector.broadcast %91 : vector<1x8x32xf32> to vector<2x8x32xf32>
    %93 = arith.addf %89, %92 : vector<2x8x32xf32>
    %94 = vector.shape_cast %93 : vector<2x8x32xf32> to vector<16x32xf32>
    %c0_45 = arith.constant 0 : index
    %c0_46 = arith.constant 0 : index
    %95 = vector.load %arg14[%c0_45, %c0_46] : memref<1x32xf32, #tpu.memory_space<vmem>>, vector<1x32xf32>
    %c0_47 = arith.constant 0 : index
    %c0_48 = arith.constant 0 : index
    %96 = vector.load %arg15[%c0_47, %c0_48] : memref<1x32xf32, #tpu.memory_space<vmem>>, vector<1x32xf32>
    %cst_49 = arith.constant dense<0.000000e+00> : vector<16xf32>
    %97 = vector.multi_reduction <add>, %94, %cst_49 [1] : vector<16x32xf32> to vector<16xf32>
    %98 = vector.shape_cast %97 : vector<16xf32> to vector<16x1xf32>
    %cst_50 = arith.constant 3.200000e+01 : f32
    %99 = vector.broadcast %cst_50 : f32 to vector<16x1xf32>
    %100 = arith.divf %98, %99 : vector<16x1xf32>
    %101 = vector.broadcast %100 : vector<16x1xf32> to vector<16x32xf32>
    %102 = arith.subf %94, %101 : vector<16x32xf32>
    %103 = arith.mulf %102, %102 : vector<16x32xf32>
    %cst_51 = arith.constant dense<0.000000e+00> : vector<16xf32>
    %104 = vector.multi_reduction <add>, %103, %cst_51 [1] : vector<16x32xf32> to vector<16xf32>
    %105 = vector.shape_cast %104 : vector<16xf32> to vector<16x1xf32>
    %cst_52 = arith.constant 3.200000e+01 : f32
    %106 = vector.broadcast %cst_52 : f32 to vector<16x1xf32>
    %107 = arith.divf %105, %106 : vector<16x1xf32>
    %108 = vector.broadcast %100 : vector<16x1xf32> to vector<16x32xf32>
    %109 = arith.subf %94, %108 : vector<16x32xf32>
    %cst_53 = arith.constant 9.99999974E-6 : f32
    %110 = vector.broadcast %cst_53 : f32 to vector<16x1xf32>
    %111 = arith.addf %107, %110 : vector<16x1xf32>
    %112 = math.rsqrt %111 : vector<16x1xf32>
    %113 = vector.broadcast %112 : vector<16x1xf32> to vector<16x32xf32>
    %114 = arith.mulf %109, %113 : vector<16x32xf32>
    %115 = vector.broadcast %95 : vector<1x32xf32> to vector<16x32xf32>
    %116 = arith.mulf %114, %115 : vector<16x32xf32>
    %117 = vector.broadcast %96 : vector<1x32xf32> to vector<16x32xf32>
    %118 = arith.addf %116, %117 : vector<16x32xf32>
    %c0_54 = arith.constant 0 : index
    %c0_55 = arith.constant 0 : index
    %119 = vector.load %arg16[%c0_54, %c0_55] : memref<32x32xf32, #tpu.memory_space<vmem>>, vector<32x32xf32>
    %cst_56 = arith.constant dense<0.000000e+00> : vector<16x32xf32>
    %120 = tpu.matmul %118, %119, %cst_56 {dimension_numbers = #tpu.dot_dimension_numbers<[1], [0], [0], [1], [0, 0, 1, 1], [], []>} : vector<16x32xf32>, vector<32x32xf32>, vector<16x32xf32> -> vector<16x32xf32>
    %c0_57 = arith.constant 0 : index
    %c0_58 = arith.constant 0 : index
    %121 = vector.load %arg17[%c0_57, %c0_58] : memref<1x32xf32, #tpu.memory_space<vmem>>, vector<1x32xf32>
    %122 = vector.broadcast %121 : vector<1x32xf32> to vector<16x32xf32>
    %123 = arith.addf %120, %122 : vector<16x32xf32>
    %cst_59 = arith.constant 5.000000e-01 : f32
    %124 = vector.broadcast %cst_59 : f32 to vector<16x32xf32>
    %125 = arith.mulf %124, %123 : vector<16x32xf32>
    %cst_60 = arith.constant 4.471500e-02 : f32
    %126 = vector.broadcast %cst_60 : f32 to vector<16x32xf32>
    %127 = arith.mulf %126, %123 : vector<16x32xf32>
    %128 = arith.mulf %127, %123 : vector<16x32xf32>
    %129 = arith.mulf %128, %123 : vector<16x32xf32>
    %130 = arith.addf %123, %129 : vector<16x32xf32>
    %cst_61 = arith.constant 0.797884583 : f32
    %131 = vector.broadcast %cst_61 : f32 to vector<16x32xf32>
    %132 = arith.mulf %131, %130 : vector<16x32xf32>
    %133 = math.tanh %132 : vector<16x32xf32>
    %cst_62 = arith.constant 1.000000e+00 : f32
    %134 = vector.broadcast %cst_62 : f32 to vector<16x32xf32>
    %135 = arith.addf %134, %133 : vector<16x32xf32>
    %136 = arith.mulf %125, %135 : vector<16x32xf32>
    %c0_63 = arith.constant 0 : index
    %c0_64 = arith.constant 0 : index
    %137 = vector.load %arg18[%c0_63, %c0_64] : memref<32x32xf32, #tpu.memory_space<vmem>>, vector<32x32xf32>
    %cst_65 = arith.constant dense<0.000000e+00> : vector<16x32xf32>
    %138 = tpu.matmul %136, %137, %cst_65 {dimension_numbers = #tpu.dot_dimension_numbers<[1], [0], [0], [1], [0, 0, 1, 1], [], []>} : vector<16x32xf32>, vector<32x32xf32>, vector<16x32xf32> -> vector<16x32xf32>
    %c0_66 = arith.constant 0 : index
    %c0_67 = arith.constant 0 : index
    %139 = vector.load %arg19[%c0_66, %c0_67] : memref<1x32xf32, #tpu.memory_space<vmem>>, vector<1x32xf32>
    %140 = vector.broadcast %139 : vector<1x32xf32> to vector<16x32xf32>
    %141 = arith.addf %138, %140 : vector<16x32xf32>
    %142 = arith.addf %118, %141 : vector<16x32xf32>
    %c0_68 = arith.constant 0 : index
    %c0_69 = arith.constant 0 : index
    %143 = vector.load %arg14[%c0_68, %c0_69] : memref<1x32xf32, #tpu.memory_space<vmem>>, vector<1x32xf32>
    %c0_70 = arith.constant 0 : index
    %c0_71 = arith.constant 0 : index
    %144 = vector.load %arg15[%c0_70, %c0_71] : memref<1x32xf32, #tpu.memory_space<vmem>>, vector<1x32xf32>
    %cst_72 = arith.constant dense<0.000000e+00> : vector<16xf32>
    %145 = vector.multi_reduction <add>, %142, %cst_72 [1] : vector<16x32xf32> to vector<16xf32>
    %146 = vector.shape_cast %145 : vector<16xf32> to vector<16x1xf32>
    %cst_73 = arith.constant 3.200000e+01 : f32
    %147 = vector.broadcast %cst_73 : f32 to vector<16x1xf32>
    %148 = arith.divf %146, %147 : vector<16x1xf32>
    %149 = vector.broadcast %148 : vector<16x1xf32> to vector<16x32xf32>
    %150 = arith.subf %142, %149 : vector<16x32xf32>
    %151 = arith.mulf %150, %150 : vector<16x32xf32>
    %cst_74 = arith.constant dense<0.000000e+00> : vector<16xf32>
    %152 = vector.multi_reduction <add>, %151, %cst_74 [1] : vector<16x32xf32> to vector<16xf32>
    %153 = vector.shape_cast %152 : vector<16xf32> to vector<16x1xf32>
    %cst_75 = arith.constant 3.200000e+01 : f32
    %154 = vector.broadcast %cst_75 : f32 to vector<16x1xf32>
    %155 = arith.divf %153, %154 : vector<16x1xf32>
    %156 = vector.broadcast %148 : vector<16x1xf32> to vector<16x32xf32>
    %157 = arith.subf %142, %156 : vector<16x32xf32>
    %cst_76 = arith.constant 9.99999974E-6 : f32
    %158 = vector.broadcast %cst_76 : f32 to vector<16x1xf32>
    %159 = arith.addf %155, %158 : vector<16x1xf32>
    %160 = math.rsqrt %159 : vector<16x1xf32>
    %161 = vector.broadcast %160 : vector<16x1xf32> to vector<16x32xf32>
    %162 = arith.mulf %157, %161 : vector<16x32xf32>
    %163 = vector.broadcast %143 : vector<1x32xf32> to vector<16x32xf32>
    %164 = arith.mulf %162, %163 : vector<16x32xf32>
    %165 = vector.broadcast %144 : vector<1x32xf32> to vector<16x32xf32>
    %166 = arith.addf %164, %165 : vector<16x32xf32>
    %167 = vector.shape_cast %166 : vector<16x32xf32> to vector<2x8x32xf32>
    %c0_77 = arith.constant 0 : index
    %c0_78 = arith.constant 0 : index
    %c0_79 = arith.constant 0 : index
    %168 = vector.load %arg20[%c0_77, %c0_78, %c0_79] : memref<2x8x32xf32, #tpu.memory_space<vmem>>, vector<2x8x32xf32>
    tpu.vector_store %arg20[%c0_77, %c0_78, %c0_79], %167 {strides = array<i32>} : memref<2x8x32xf32, #tpu.memory_space<vmem>>, vector<2x8x32xf32>,
    return
  }
}

</mosaic_0001>

<bundles_post_ra>
// kernel: self_attention_layer.1
= control target key start
LH: loop header
LB: loop body
LE: loop exit
PB: predicated region body
PF: predicated region fallthrough
CT: control target
= control target key end

     0   :  { %s2293_s0 = inlined_call_operand.hbm [shape: f32[2,8,32], index: 0, kind: input, shape index: {}]   ;;  %s2294_s1 = inlined_call_operand.hbm [shape: f32[2,8,32], index: 1, kind: input, shape index: {}]   ;;  %s2295_s2 = inlined_call_operand.vmem [shape: f32[8,8], index: 2, kind: input, shape index: {}]   ;;  %s2296_s3 = inlined_call_operand.vmem [shape: f32[8,32], index: 3, kind: input, shape index: {}]   ;;  %s2297_s4 = inlined_call_operand.hbm [shape: f32[8,32], index: 4, kind: input, shape index: {}]   ;;  %s2298_s5 = inlined_call_operand.vmem [shape: f32[8,32], index: 5, kind: input, shape index: {}]   ;;  %s2299_s6 = inlined_call_operand.hbm [shape: f32[32,32], index: 6, kind: input, shape index: {}]   ;;  %s2300_s7 = inlined_call_operand.vmem [shape: f32[1,32], index: 7, kind: input, shape index: {}]   ;;  %s2301_s8 = inlined_call_operand.hbm [shape: f32[32,32], index: 8, kind: input, shape index: {}]   ;;  %s2302_s9 = inlined_call_operand.vmem [shape: f32[1,32], index: 9, kind: input, shape index: {}]   ;;  %s2303_s10 = inlined_call_operand.hbm [shape: f32[32,32], index: 10, kind: input, shape index: {}]   ;;  %s2304_s11 = inlined_call_operand.hbm [shape: f32[1,32], index: 11, kind: input, shape index: {}]   ;;  %s2305_s12 = inlined_call_operand.hbm [shape: f32[4,8,32], index: 12, kind: input, shape index: {}]   ;;  %s2306_s13 = inlined_call_operand.hbm [shape: f32[1,32], index: 13, kind: input, shape index: {}]   ;;  %s2307_s14 = inlined_call_operand.vmem [shape: f32[1,32], index: 14, kind: input, shape index: {}]   ;;  %s2308_s15 = inlined_call_operand.vmem [shape: f32[1,32], index: 15, kind: input, shape index: {}]   ;;  %s2309_s16 = inlined_call_operand.hbm [shape: f32[32,32], index: 16, kind: input, shape index: {}]   ;;  %s2310_s17 = inlined_call_operand.hbm [shape: f32[1,32], index: 17, kind: input, shape index: {}]   ;;  %s2311_s18 = inlined_call_operand.hbm [shape: f32[32,32], index: 18, kind: input, shape index: {}]   ;;  %s2312_s19 = inlined_call_operand.hbm [shape: f32[1,32], index: 19, kind: input, shape index: {}]   ;;  %s2313_s20 = inlined_call_operand.hbm [shape: f32[2,8,32], index: 20, kind: output, shape index: {0}]   ;;  %s2314_s21 = inlined_call_operand.vmem [shape: f32[4,2,8,8], index: 21, kind: output, shape index: {1}]  }
   0x1   :  { %2315 = sst [smem:[#allocation32_spill]] %s2293_s0 }
   0x2   :  { %2316 = sst [smem:[#allocation33_spill]] %s2294_s1 }
   0x3   :  { %2317 = sst [smem:[#allocation34_spill]] %s2295_s2 }
   0x4   :  { %2318 = sst [smem:[#allocation35_spill]] %s2296_s3 }
   0x5   :  { %2319 = sst [smem:[#allocation36_spill]] %s2297_s4 }
   0x6   :  { %2320 = sst [smem:[#allocation37_spill]] %s2298_s5 }
   0x7   :  { %27 = vsyncpa [#allocation3], 0 }
   0x8   :  { %28 = vsyncpa [#allocation6], 0 }
   0x9   :  { %29 = vsyncpa [#allocation9], 0 }
   0xa   :  { %30 = vsyncpa [#allocation12], 0 }
   0xb   :  { %31 = vsyncpa [#allocation15], 0 }
   0xc   :  { %32 = vsyncpa [#allocation18], 0 }
   0xd   :  { %33 = vsyncpa [#allocation21], 0 }
   0xe   :  { %34 = vsyncpa [#allocation4], 0  ;;  %s2321_s26 = sld [smem:[#allocation33_spill]]  ;;  %s1873_s3 = smov [#allocation5]  }
   0xf   :  { %s54_s28 = sshll.u32 %s1873_s3, 4  ;;  %s82_s4 = sshll.u32 %s2299_s6, 4  ;;  %s55_s28 = int_to_ptr.vmem [resolvable:$true] %s54_s28  ;;  %s83_s4 = int_to_ptr.hbm [resolvable:$true] %s82_s4 }
  0x10   :  { %s1874_s30 = smov 128   ;;  %s1875_s5 = smov 8  }
  0x11   :  { %s1876_s22 = smov [#allocation8]   ;;  %s112_s2 = sshll.u32 %s2303_s10, 4  ;;  %s113_s2 = int_to_ptr.hbm [resolvable:$true] %s112_s2 }
  0x12   :  { %s84_s23 = sshll.u32 %s1876_s22, 4  ;;  %s1877_s3 = smov [#allocation11]   ;;  %s85_s23 = int_to_ptr.vmem [resolvable:$true] %s84_s23 }
  0x13   :  { %90 = dma.hbm_to_vmem [thread:$0]  %s83_s4, 512, %s85_s23, [#allocation9], %s1874_s30, %s1874_s30, %s1875_s5  }
  0x14   :  { %s52_s27 = sshll.u32 %s2321_s26, 4  ;;  %s136_s26 = sshll.u32 %s2305_s12, 4  ;;  %s53_s27 = int_to_ptr.hbm [resolvable:$true] %s52_s27  ;;  %s137_s26 = int_to_ptr.hbm [resolvable:$true] %s136_s26 }
  0x15   :  { %60 = dma.hbm_to_vmem [thread:$0]  %s53_s27, 256, %s55_s28, [#allocation6], %s1874_s30, %s1874_s30, %s1875_s5  }
  0x16   :  { %s114_s29 = sshll.u32 %s1877_s3, 4  ;;  %s1878_s27 = smov [#allocation14]   ;;  %s115_s29 = int_to_ptr.vmem [resolvable:$true] %s114_s29 }
  0x17   :  { %120 = dma.hbm_to_vmem [thread:$0]  %s113_s2, 512, %s115_s29, [#allocation12], %s1874_s30, %s1874_s30, %s1875_s5  }
  0x18   :  { %s138_s10 = sshll.u32 %s1878_s27, 4  ;;  %s164_s22 = sshll.u32 %s2309_s16, 4  ;;  %s139_s10 = int_to_ptr.vmem [resolvable:$true] %s138_s10  ;;  %s165_s22 = int_to_ptr.hbm [resolvable:$true] %s164_s22 }
  0x19   :  { %144 = dma.hbm_to_vmem [thread:$0]  %s137_s26, 512, %s139_s10, [#allocation15], %s1874_s30, %s1874_s30, %s1875_s5  }
  0x1a   :  { %s188_s23 = sshll.u32 %s2311_s18, 4  ;;  %s1879_s1 = smov [#allocation17]   ;;  %s189_s23 = int_to_ptr.hbm [resolvable:$true] %s188_s23 }
  0x1b   :  { %s166_s24 = sshll.u32 %s1879_s1, 4  ;;  %s1880_s2 = smov [#allocation20]   ;;  %s167_s24 = int_to_ptr.vmem [resolvable:$true] %s166_s24 }
  0x1c   :  { %172 = dma.hbm_to_vmem [thread:$0]  %s165_s22, 512, %s167_s24, [#allocation18], %s1874_s30, %s1874_s30, %s1875_s5  }
  0x1d   :  { %s190_s16 = sshll.u32 %s1880_s2, 4  ;;  %s2322_s3 = sld [smem:[#allocation32_spill]]  ;;  %s191_s16 = int_to_ptr.vmem [resolvable:$true] %s190_s16 }
  0x1e   :  { %196 = dma.hbm_to_vmem [thread:$0]  %s189_s23, 512, %s191_s16, [#allocation21], %s1874_s30, %s1874_s30, %s1875_s5  }
  0x1f   :  { %s2323_s27 = sld [smem:[#allocation36_spill]]  ;;  %s1881_s28 = smov [#allocation2]  }
  0x20   :  { %s41_s0 = sshll.u32 %s1881_s28, 4  ;;  %s1882_s22 = smov [#allocation7]   ;;  %s42_s0 = int_to_ptr.vmem [resolvable:$true] %s41_s0 }
  0x21   :  { %s72_s12 = sshll.u32 %s1882_s22, 4  ;;  %s97_s24 = sshll.u32 %s2301_s8, 4  ;;  %s73_s12 = int_to_ptr.vmem [resolvable:$true] %s72_s12  ;;  %s98_s24 = int_to_ptr.hbm [resolvable:$true] %s97_s24 }
  0x22   :  { %s126_s16 = sshll.u32 %s2304_s11, 4  ;;  %s1883_s6 = smov [#allocation10]   ;;  %s127_s16 = int_to_ptr.hbm [resolvable:$true] %s126_s16 }
  0x23   :  { %s39_s29 = sshll.u32 %s2322_s3, 4  ;;  %s99_s25 = sshll.u32 %s1883_s6, 4  ;;  %s40_s29 = int_to_ptr.hbm [resolvable:$true] %s39_s29  ;;  %s100_s25 = int_to_ptr.vmem [resolvable:$true] %s99_s25 }
  0x24   :  { %47 = dma.hbm_to_vmem [thread:$0]  %s40_s29, 256, %s42_s0, [#allocation3], %s1874_s30, %s1874_s30, %s1875_s5  }
  0x25   :  { %s70_s10 = sshll.u32 %s2323_s27, 4  ;;  %s1884_s3 = smov [#allocation13]   ;;  %s71_s10 = int_to_ptr.hbm [resolvable:$true] %s70_s10 }
  0x26   :  { %75 = dma.hbm_to_vmem [thread:$0]  %s71_s10, 128, %s73_s12, [#allocation6]  }
  0x27   :  { %105 = dma.hbm_to_vmem [thread:$0]  %s98_s24, 512, %s100_s25, [#allocation9], %s1874_s30, %s1874_s30, %s1875_s5  }
  0x28   :  { %s128_s29 = sshll.u32 %s1884_s3, 4  ;;  %s150_s8 = sshll.u32 %s2306_s13, 4  ;;  %s129_s29 = int_to_ptr.vmem [resolvable:$true] %s128_s29  ;;  %s151_s8 = int_to_ptr.hbm [resolvable:$true] %s150_s8 }
  0x29   :  { %131 = dma.hbm_to_vmem [thread:$0]  %s127_s16, 16, %s129_s29, [#allocation12]  }
  0x2a   :  { %s178_s11 = sshll.u32 %s2310_s17, 4  ;;  %s1885_s28 = smov [#allocation16]   ;;  %s179_s11 = int_to_ptr.hbm [resolvable:$true] %s178_s11 }
  0x2b   :  { %s152_s0 = sshll.u32 %s1885_s28, 4  ;;  %s1886_s22 = smov [#allocation19]   ;;  %s153_s0 = int_to_ptr.vmem [resolvable:$true] %s152_s0 }
  0x2c   :  { %155 = dma.hbm_to_vmem [thread:$0]  %s151_s8, 16, %s153_s0, [#allocation15]  }
  0x2d   :  { %s180_s12 = sshll.u32 %s1886_s22, 4  ;;  %s202_s24 = sshll.u32 %s2312_s19, 4  ;;  %s181_s12 = int_to_ptr.vmem [resolvable:$true] %s180_s12  ;;  %s203_s24 = int_to_ptr.hbm [resolvable:$true] %s202_s24 }
  0x2e   :  { %183 = dma.hbm_to_vmem [thread:$0]  %s179_s11, 16, %s181_s12, [#allocation18]  }
  0x2f   :  { %s1887_s13 = smov [#allocation22]  }
  0x30   :  { %s204_s23 = sshll.u32 %s1887_s13, 4  ;;  %s205_s23 = int_to_ptr.vmem [resolvable:$true] %s204_s23 }
  0x31   :  { %207 = dma.hbm_to_vmem [thread:$0]  %s203_s24, 16, %s205_s23, [#allocation21]  }
  0x32   :  { %1857 = dma.done.wait [#allocation3], 256  }
  0x33   :  { %1858 = vsyncadd [#allocation3], 4294967040 }
  0x34   :  { %1859 = dma.done.wait [#allocation6], 384  }
  0x35   :  { %1860 = vsyncadd [#allocation6], 4294966912 }
  0x36   :  { %1861 = dma.done.wait [#allocation9], 1024  }
  0x37   :  { %1862 = vsyncadd [#allocation9], 4294966272 }
  0x38   :  { %1863 = dma.done.wait [#allocation12], 528  }
  0x39   :  { %1864 = vsyncadd [#allocation12], 4294966768 }
  0x3a   :  { %1865 = dma.done.wait [#allocation15], 528  }
  0x3b   :  { %1866 = vsyncadd [#allocation15], 4294966768 }
  0x3c   :  { %1867 = dma.done.wait [#allocation18], 528  }
  0x3d   :  { %1868 = vsyncadd [#allocation18], 4294966768 }
  0x3e   :  { %1869 = dma.done.wait [#allocation21], 528  }
  0x3f   :  { %1870 = vsyncadd [#allocation21], 4294966768  ;;  %v311_v0 = vld [vmem:[#allocation10 + $0x18] sm:$0xff]  ;;  %v310_v1 = vld [vmem:[#allocation10 + $0x10] sm:$0xff]  ;;  %s2324_s2 = sld [smem:[#allocation35_spill]]  ;;  %vm278_vm0 = vcmask 261120  }
  0x40   :  { %v273_v2 = vld [vmem:[#allocation8 + $0x18] sm:$0xff]  ;;  %334 = vmatpush.msra.mxu1 %v311_v0  ;;  %v309_v3 = vld [vmem:[#allocation10 + $0x8] sm:$0xff]  ;;  %v272_v4 = vld [vmem:[#allocation8 + $0x10] sm:$0xff]  ;;  %vm424_vm1 = vcmask 64512   ;;  %s1888_s29 = smov 112   ;;  %s1889_s18 = smov 120  }
  0x41   :  { %297 = vmatpush.msra.mxu0 %v273_v2  ;;  %v271_v5 = vld [vmem:[#allocation8 + $0x8] sm:$0xff]  ;;  %v267_v7 = vld [vmem:[#allocation7] sm:$0xff]  ;;  %v308_v10 = vld [vmem:[#allocation10] sm:$0xff]  ;;  %s2325_s8 = sld [smem:[#allocation34_spill]] }
  0x42   :  { %v265_v6 = vld [vmem:[#allocation5] sm:$0xff]  ;;  %335 = vmatpush.msra.mxu1 %v310_v1  ;;  %v260_v8 = vld [vmem:[#allocation2] sm:$0xff]  ;;  %v270_v12 = vld [vmem:[#allocation8] sm:$0xff]  ;;  %s2326_s25 = sld [smem:[#allocation37_spill]] }
  0x43   :  { %298 = vmatpush.msra.mxu0 %v272_v4  ;;  %v268_v11 = vadd.f32 %v267_v7, %v265_v6  ;;  %v266_v14 = vld [vmem:[#allocation5 + $0x8] sm:$0xff]  ;;  %v261_v15 = vld [vmem:[#allocation2 + $0x8] sm:$0xff]  ;;  %v1467_v18 = vld [vmem:[%s2302_s9] ss:$0 sm:$0xff] }
  0x44   :  { %336 = vmatpush.msra.mxu1 %v309_v3  ;;  %v269_v16 = vadd.f32 %v267_v7, %v266_v14  ;;  %v1468_v19 = vld [vmem:[%s2300_s7] ss:$0 sm:$0xff]  ;;  %s1890_s7 = smov 104   ;;  %v347_v29 = vld [vmem:[#allocation11 + $0x10] sm:$0xff]  ;;  %v346_v30 = vld [vmem:[#allocation11 + $0x8] sm:$0xff] }
  0x45   :  { %v262_v9 = vld [vmem:[%s2324_s2] sm:$0xff]  ;;  %299 = vmatpush.msra.mxu0 %v271_v5  ;;  %v345_v31 = vld [vmem:[#allocation11] sm:$0xff] }
  0x46   :  { %v263_v13 = vadd.f32 %v262_v9, %v260_v8  ;;  %337 = vmatpush.msra.mxu1 %v308_v10  ;;  %v264_v17 = vadd.f32 %v262_v9, %v261_v15  ;;  %v348_v28 = vld [vmem:[#allocation11 + $0x18] sm:$0xff]  ;;  %v1469_v53 = vld [vmem:[#allocation13] ss:$0 sm:$0xff] }
  0x47   :  { %300 = vmatpush.msra.mxu0 %v270_v12  ;;  %1402 = vmatmul.msk.f32.vlgmr.msra.gmra.mxu1 %vm278_vm0, %v268_v11  ;;  %v625_v41 = vld [vmem:[%s2325_s8] sm:$0xff]  ;;  %s1377_s8 = sshll.u32 %s2313_s20, 4  ;;  %s1378_s8 = int_to_ptr.hbm [resolvable:$true] %s1377_s8 }
  0x48   :  { %1400 = vmatmul.msk.f32.vlgmr.msra.gmra.mxu0 %vm278_vm0, %v263_v13  ;;  %365 = vmatpush.msra.mxu2 %v348_v28  ;;  %vm626_vm2 = vcmp.gt.f32.partialorder %v625_v41, 0.5 }
  0x4a   :  { %366 = vmatpush.msra.mxu2 %v347_v29 }
  0x4c   :  { %367 = vmatpush.msra.mxu2 %v346_v30 }
  0x4e   :  { %368 = vmatpush.msra.mxu2 %v345_v31 }
  0x4f   :  { %1403 = vmatmul.msk.f32.gmra.mxu1 %vm278_vm0, %v269_v16  ;;  %1404 = vmatmul.msk.f32.vlgmr.msra.gmra.mxu2 %vm278_vm0, %v268_v11 }
  0x50   :  { %1401 = vmatmul.msk.f32.gmra.mxu0 %vm278_vm0, %v264_v17 }
  0x57   :  { %1405 = vmatmul.msk.f32.gmra.mxu2 %vm278_vm0, %v269_v16 }
  0xc4   :  { %v339_v20 = vpop.f32.mrf.mxu1 }
  0xc5   :  { %v302_v21 = vpop.f32.mrf.mxu0  ;;  %v340_v22 = vadd.f32 %v1467_v18, %v339_v20 }
  0xc6   :  { %v303_v23 = vadd.f32 %v1468_v19, %v302_v21 }
  0xc7   :  { %396 = vrot.lane.b32.xlu1 %v340_v22, %s1888_s29  ;;  %392 = vrot.lane.b32.xlu0 %v340_v22, %s1889_s18 }
  0xc8   :  { %1406 = vmatpush.xpose.msk.msra.mxu3 %vm424_vm1, %v340_v22 }
  0xcb   :  { %1407 = vmatmul.msk.f32.vlgmr.msra.gmra.mxu3 %vm424_vm1, %v303_v23 }
  0xcc   :  { %v342_v24 = vpop.f32.mrf.mxu1 }
  0xcd   :  { %v305_v25 = vpop.f32.mrf.mxu0  ;;  %v343_v26 = vadd.f32 %v1467_v18, %v342_v24 }
  0xce   :  { %v306_v27 = vadd.f32 %v1468_v19, %v305_v25 }
  0xcf   :  { %398 = vrot.lane.b32.xlu2 %v343_v26, %s1888_s29  ;;  %1408 = vmatpush.xpose.msk.msrb.mxu3 %vm424_vm1, %v343_v26 }
  0xd0   :  { %382 = vrot.lane.b32.xlu1 %v303_v23, %s1888_s29  ;;  %378 = vrot.lane.b32.xlu0 %v303_v23, %s1889_s18 }
  0xd2   :  { %v370_v54 = vpop.f32.mrf.mxu2 }
  0xd3   :  { %1409 = vmatmul.msk.f32.vlgmr.msrb.gmra.mxu3 %vm424_vm1, %v306_v27  ;;  %v2116_v55 = vadd.f32 %v1469_v53, %v370_v54 }
  0xd5   :  { %855 = vmatpush.msrb.mxu1 %v2116_v55 }
  0xd7   :  { %400 = vrot.lane.b32.xlu2 %v340_v22, %s1890_s7 }
  0xd8   :  { %386 = vrot.lane.b32.xlu1 %v303_v23, %s1890_s7  ;;  %384 = vrot.lane.b32.xlu0 %v306_v27, %s1888_s29 }
  0xda   :  { %v373_v56 = vpop.f32.mrf.mxu2 }
  0xdb   :  { %v2119_v57 = vadd.f32 %v1469_v53, %v373_v56 }
  0xdd   :  { %v1462_v28 = vpack.i.bf16 %v2119_v57, %v2116_v55 }
  0xdf   :  { %394 = vrot.lane.b32.xlu2 %v343_v26, %s1889_s18 }
  0xe0   :  { %402 = vrot.lane.b32.xlu1 %v343_v26, %s1890_s7  ;;  %380 = vrot.lane.b32.xlu0 %v306_v27, %s1889_s18 }
  0xe7   :  { %388 = vrot.lane.b32.xlu2 %v306_v27, %s1890_s7 }
 0x129   :  { %v399_v32 = vpop.permute.xlu2 %398 }
 0x12a   :  { %1416 = vmatpush.xpose.msk.msrb.mxu2 %vm424_vm1, %v399_v32 }
 0x12e   :  { %878 = vmatpush.msra.mxu2 %v2119_v57 }
 0x131   :  { %v401_v33 = vpop.permute.xlu2 %400 }
 0x139   :  { %v395_v34 = vpop.permute.xlu2 %394  ;;  %v397_v35 = vpop.permute.xlu1 %396 }
 0x13a   :  { %v393_v36 = vpop.permute.xlu0 %392  ;;  %1412 = vmatpush.xpose.msk.msrb.mxu0 %vm424_vm1, %v395_v34 }
 0x13b   :  { %1410 = vmatpush.xpose.msk.msra.mxu3 %vm424_vm1, %v393_v36 }
 0x13f   :  { %1414 = vmatpush.xpose.msk.msrb.mxu3 %vm424_vm1, %v397_v35 }
 0x141   :  { %v389_v51 = vpop.permute.xlu2 %388 }
 0x142   :  { %v383_v37 = vpop.permute.xlu1 %382  ;;  %v379_v38 = vpop.permute.xlu0 %378 }
 0x143   :  { %1411 = vmatmul.msk.f32.vlgmr.msra.gmra.mxu3 %vm424_vm1, %v379_v38 }
 0x144   :  { %1418 = vmatpush.xpose.msk.msra.mxu3 %vm424_vm1, %v401_v33 }
 0x14a   :  { %v387_v39 = vpop.permute.xlu1 %386  ;;  %v385_v40 = vpop.permute.xlu0 %384 }
 0x14b   :  { %1415 = vmatmul.msk.f32.vlgmr.msrb.gmra.mxu3 %vm424_vm1, %v383_v37  ;;  %1417 = vmatmul.msk.f32.vlgmr.msrb.gmra.mxu2 %vm424_vm1, %v385_v40 }
 0x14e   :  { %v446_v42 = vpop.f32.mrf.mxu3 }
 0x14f   :  { %v617_v43 = vmul.f32 0.35355338, %v446_v42 }
 0x151   :  { %v629_v44 = vsel %vm626_vm2, -3.4028235e+38, %v617_v43 }
 0x152   :  { %v403_v45 = vpop.permute.xlu1 %402  ;;  %v381_v46 = vpop.permute.xlu0 %380  ;;  %v637_v47 = vsel %vm424_vm1, %v629_v44, -inf }
 0x153   :  { %1413 = vmatmul.msk.f32.vlgmr.msrb.gmra.mxu0 %vm424_vm1, %v381_v46  ;;  %1419 = vmatmul.msk.f32.vlgmr.msra.gmra.mxu3 %vm424_vm1, %v387_v39 }
 0x154   :  { %1420 = vmatpush.xpose.msk.msra.mxu0 %vm424_vm1, %v403_v45  ;;  %638 = vmax.xlane.f32.xlu0 %v637_v47 }
 0x156   :  { %v470_v48 = vpop.f32.mrf.mxu3 }
 0x157   :  { %v618_v49 = vmul.f32 0.35355338, %v470_v48 }
 0x159   :  { %v630_v50 = vsel %vm626_vm2, -3.4028235e+38, %v618_v49 }
 0x15a   :  { %v640_v52 = vsel %vm424_vm1, %v630_v50, -inf }
 0x15b   :  { %1421 = vmatmul.msk.f32.vlgmr.msra.gmra.mxu0 %vm424_vm1, %v389_v51  ;;  %641 = vmax.xlane.f32.xlu2 %v640_v52 }
 0x1c6   :  { %v494_v58 = vpop.f32.mrf.mxu3 }
 0x1c7   :  { %v639_v59 = vpop.xlane.xlu0 %638  ;;  %v619_v60 = vmul.f32 0.35355338, %v494_v58 }
 0x1c8   :  { %v661_v61 = vsub.f32 %v629_v44, %v639_v59 }
 0x1c9   :  { %v631_v62 = vsel %vm626_vm2, -3.4028235e+38, %v619_v60 }
 0x1ca   :  { %v669_v63 = vmul.f32 1.442695, %v661_v61  ;;  %v643_v0 = vsel %vm424_vm1, %v631_v62, -inf }
 0x1cb   :  { %644 = vmax.xlane.f32.xlu1 %v643_v0 }
 0x1cc   :  { %1475 = vpow2.f32 %v669_v63 }
 0x1ce   :  { %v566_v1 = vpop.f32.mrf.mxu2  ;;  %v542_v3 = vpop.f32.mrf.mxu3 }
 0x1cf   :  { %v622_v2 = vmul.f32 0.35355338, %v566_v1  ;;  %v642_v4 = vpop.xlane.xlu2 %641  ;;  %v621_v14 = vmul.f32 0.35355338, %v542_v3 }
 0x1d0   :  { %v518_v5 = vpop.f32.mrf.mxu0  ;;  %v662_v10 = vsub.f32 %v630_v50, %v642_v4 }
 0x1d1   :  { %v620_v6 = vmul.f32 0.35355338, %v518_v5  ;;  %v634_v7 = vsel %vm626_vm2, -3.4028235e+38, %v622_v2  ;;  %v633_v20 = vsel %vm626_vm2, -3.4028235e+38, %v621_v14 }
 0x1d2   :  { %v2125_v8 = vpop.eup %1475  ;;  %v652_v9 = vsel %vm424_vm1, %v634_v7, -inf  ;;  %v671_v15 = vmul.f32 1.442695, %v662_v10  ;;  %v649_v25 = vsel %vm424_vm1, %v633_v20, -inf }
 0x1d3   :  { %653 = vmax.xlane.f32.xlu0 %v652_v9  ;;  %v685_v11 = vsel %vm424_vm1, %v2125_v8, 0.0  ;;  %v632_v12 = vsel %vm626_vm2, -3.4028235e+38, %v620_v6 }
 0x1d4   :  { %686 = vadd.xlane.f32.xlu1 %v685_v11  ;;  %v646_v13 = vsel %vm424_vm1, %v632_v12, -inf  ;;  %1477 = vpow2.f32 %v671_v15 }
 0x1d5   :  { %647 = vmax.xlane.f32.xlu2 %v646_v13 }
 0x1d6   :  { %v590_v16 = vpop.f32.mrf.mxu3 }
 0x1d7   :  { %v623_v17 = vmul.f32 0.35355338, %v590_v16 }
 0x1d8   :  { %v614_v18 = vpop.f32.mrf.mxu0 }
 0x1d9   :  { %v624_v19 = vmul.f32 0.35355338, %v614_v18  ;;  %v635_v21 = vsel %vm626_vm2, -3.4028235e+38, %v623_v17 }
 0x1da   :  { %v655_v22 = vsel %vm424_vm1, %v635_v21, -inf  ;;  %v2138_v26 = vpop.eup %1477 }
 0x1db   :  { %v636_v23 = vsel %vm626_vm2, -3.4028235e+38, %v624_v19  ;;  %v688_v27 = vsel %vm424_vm1, %v2138_v26, 0.0 }
 0x1dc   :  { %656 = vmax.xlane.f32.xlu1 %v655_v22  ;;  %v658_v24 = vsel %vm424_vm1, %v636_v23, -inf }
 0x1dd   :  { %659 = vmax.xlane.f32.xlu0 %v658_v24  ;;  %650 = vmax.xlane.f32.xlu2 %v649_v25 }
 0x1e5   :  { %689 = vadd.xlane.f32.xlu0 %v688_v27 }
 0x1f5   :  { %1463 = vrot.lane.b32.xlu1 %v1462_v28, %s1888_s29  ;;  %406 = vrot.lane.b32.xlu2 %v2116_v55, %s1889_s18 }
 0x23e   :  { %v645_v29 = vpop.xlane.xlu1 %644 }
 0x23f   :  { %v663_v30 = vsub.f32 %v631_v62, %v645_v29 }
 0x241   :  { %v673_v31 = vmul.f32 1.442695, %v663_v30 }
 0x243   :  { %1479 = vpow2.f32 %v673_v31 }
 0x246   :  { %v654_v32 = vpop.xlane.xlu0 %653 }
 0x247   :  { %v666_v33 = vsub.f32 %v634_v7, %v654_v32  ;;  %v687_v34 = vpop.xlane.xlu1 %686 }
 0x248   :  { %1481 = vrcp.f32 %v687_v34  ;;  %v648_v35 = vpop.xlane.xlu2 %647  ;;  %v718_v50 = vand.u32 2147483647, %v687_v34  ;;  %v720_v51 = vand.u32 2147483648, %v687_v34  ;;  %vm714_vm4 = vweird.f32 %v687_v34 }
 0x249   :  { %v2147_v36 = vpop.eup %1479  ;;  %v679_v37 = vmul.f32 1.442695, %v666_v33  ;;  %v664_v38 = vsub.f32 %v632_v12, %v648_v35 }
 0x24a   :  { %v691_v39 = vsel %vm424_vm1, %v2147_v36, 0.0  ;;  %v721_v62 = vor.u32 1.1754944e-38, %v720_v51  ;;  %vm719_vm6 = vcmp.eq.f32.partialorder %v718_v50, 8.507059e+37 }
 0x24b   :  { %1483 = vpow2.f32 %v679_v37  ;;  %v675_v40 = vmul.f32 1.442695, %v664_v38  ;;  %692 = vadd.xlane.f32.xlu2 %v691_v39 }
 0x24d   :  { %1485 = vpow2.f32 %v675_v40 }
 0x24e   :  { %v1482_v41 = vpop.eup %1481 }
 0x24f   :  { %v710_v42 = vmul.f32 %v1482_v41, %v687_v34  ;;  %v657_v43 = vpop.xlane.xlu1 %656  ;;  %vm715_vm3 = vweird.f32 %v1482_v41  ;;  %v1021_v34 = vld [vmem:[#allocation14] sm:$0xff] }
 0x250   :  { %v660_v44 = vpop.xlane.xlu0 %659  ;;  %v651_v45 = vpop.xlane.xlu2 %650  ;;  %v667_v56 = vsub.f32 %v635_v21, %v657_v43  ;;  %vm716_vm5 = vmor %vm714_vm4, %vm715_vm3 }
 0x251   :  { %v2151_v46 = vpop.eup %1483  ;;  %v711_v47 = vsub.f32 1.0, %v710_v42  ;;  %v668_v48 = vsub.f32 %v636_v23, %v660_v44  ;;  %v665_v49 = vsub.f32 %v633_v20, %v651_v45 }
 0x252   :  { %v700_v52 = vsel %vm424_vm1, %v2151_v46, 0.0  ;;  %v681_v63 = vmul.f32 1.442695, %v667_v56 }
 0x253   :  { %v2155_v53 = vpop.eup %1485  ;;  %v712_v54 = vmul.f32 %v1482_v41, %v711_v47  ;;  %v683_v58 = vmul.f32 1.442695, %v668_v48  ;;  %v677_v59 = vmul.f32 1.442695, %v665_v49  ;;  %701 = vadd.xlane.f32.xlu2 %v700_v52 }
 0x254   :  { %v694_v60 = vsel %vm424_vm1, %v2155_v53, 0.0 }
 0x255   :  { %v713_v61 = vadd.f32 %v1482_v41, %v712_v54  ;;  %1487 = vpow2.f32 %v683_v58  ;;  %695 = vadd.xlane.f32.xlu1 %v694_v60 }
 0x256   :  { %1489 = vpow2.f32 %v677_v59 }
 0x257   :  { %v717_v0 = vsel %vm716_vm5, %v1482_v41, %v713_v61 }
 0x258   :  { %v690_v1 = vpop.xlane.xlu0 %689  ;;  %v407_v2 = vpop.permute.xlu2 %406  ;;  %v722_v3 = vsel %vm719_vm6, %v721_v62, %v717_v0 }
 0x259   :  { %1491 = vrcp.f32 %v690_v1  ;;  %901 = vmatpush.msrb.mxu3 %v407_v2  ;;  %v723_v4 = vmul.f32 %v2125_v8, %v722_v3  ;;  %v735_v13 = vand.u32 2147483648, %v690_v1  ;;  %v733_v15 = vand.u32 2147483647, %v690_v1 }
 0x25a   :  { %1493 = vpow2.f32 %v681_v63  ;;  %vm729_vm8 = vweird.f32 %v690_v1 }
 0x25b   :  { %v2161_v5 = vpop.eup %1487  ;;  %829 = vst.msk [vmem:[%s2314_s21] sm:$0xff] %vm424_vm1, %v723_v4  ;;  %1422 = vmatmul.msk.f32.vlgmr.msrb.gmra.mxu1 %vm424_vm1, %v723_v4  ;;  %v736_v18 = vor.u32 1.1754944e-38, %v735_v13  ;;  %vm734_vm10 = vcmp.eq.f32.partialorder %v733_v15, 8.507059e+37 }
 0x25c   :  { %v2163_v6 = vpop.eup %1489  ;;  %v706_v7 = vsel %vm424_vm1, %v2161_v5, 0.0 }
 0x25d   :  { %707 = vadd.xlane.f32.xlu0 %v706_v7  ;;  %v697_v9 = vsel %vm424_vm1, %v2163_v6, 0.0 }
 0x25e   :  { %698 = vadd.xlane.f32.xlu1 %v697_v9 }
 0x25f   :  { %v1492_v8 = vpop.eup %1491 }
 0x260   :  { %v725_v10 = vmul.f32 %v1492_v8, %v690_v1  ;;  %v2174_v11 = vpop.eup %1493  ;;  %vm730_vm7 = vweird.f32 %v1492_v8 }
 0x261   :  { %v703_v16 = vsel %vm424_vm1, %v2174_v11, 0.0  ;;  %vm731_vm9 = vmor %vm729_vm8, %vm730_vm7 }
 0x262   :  { %v726_v12 = vsub.f32 1.0, %v725_v10 }
 0x264   :  { %v727_v14 = vmul.f32 %v1492_v8, %v726_v12 }
 0x265   :  { %704 = vadd.xlane.f32.xlu0 %v703_v16 }
 0x266   :  { %v728_v17 = vadd.f32 %v1492_v8, %v727_v14 }
 0x267   :  { %v1464_v19 = vpop.permute.xlu1 %1463 }
 0x268   :  { %v732_v20 = vsel %vm731_vm9, %v1492_v8, %v728_v17  ;;  %v1466_v21 = vunpack.i.h.bf16 %v1464_v19  ;;  %v1465_v22 = vunpack.i.l.bf16 %v1464_v19 }
 0x269   :  { %v737_v23 = vsel %vm734_vm10, %v736_v18, %v732_v20 }
 0x26a   :  { %947 = vmatpush.msra.mxu1 %v1465_v22  ;;  %970 = vmatpush.msrb.mxu2 %v1466_v21  ;;  %v738_v24 = vmul.f32 %v2138_v26, %v737_v23 }
 0x26b   :  { %408 = vrot.lane.b32.xlu2 %v2119_v57, %s1889_s18 }
 0x26c   :  { %830 = vst.msk [vmem:[%s2314_s21 + $0x8] sm:$0xff] %vm424_vm1, %v738_v24  ;;  %1423 = vmatmul.msk.f32.vlgmr.msra.gmra.mxu2 %vm424_vm1, %v738_v24  ;;  %1046 = vmatpush.msrb.mxu1 %v1021_v34 }
 0x277   :  { %420 = vrot.lane.b32.xlu1 %v2119_v57, %s1890_s7 }
 0x279   :  { %418 = vrot.lane.b32.xlu0 %v2116_v55, %s1890_s7 }
 0x2be   :  { %v693_v25 = vpop.xlane.xlu2 %692 }
 0x2bf   :  { %1495 = vrcp.f32 %v693_v25  ;;  %v750_v31 = vand.u32 2147483648, %v693_v25  ;;  %v748_v33 = vand.u32 2147483647, %v693_v25  ;;  %vm744_vm12 = vweird.f32 %v693_v25 }
 0x2c1   :  { %v751_v55 = vor.u32 1.1754944e-38, %v750_v31  ;;  %vm749_vm14 = vcmp.eq.f32.partialorder %v748_v33, 8.507059e+37 }
 0x2c5   :  { %v1496_v27 = vpop.eup %1495 }
 0x2c6   :  { %v740_v26 = vmul.f32 %v1496_v27, %v693_v25  ;;  %v702_v28 = vpop.xlane.xlu2 %701  ;;  %vm745_vm11 = vweird.f32 %v1496_v27 }
 0x2c7   :  { %1497 = vrcp.f32 %v702_v28  ;;  %vm746_vm13 = vmor %vm744_vm12, %vm745_vm11  ;;  %v793_v47 = vand.u32 2147483647, %v702_v28  ;;  %v795_v48 = vand.u32 2147483648, %v702_v28  ;;  %vm789_vm2 = vweird.f32 %v702_v28 }
 0x2c8   :  { %v741_v29 = vsub.f32 1.0, %v740_v26  ;;  %v696_v30 = vpop.xlane.xlu1 %695 }
 0x2c9   :  { %1499 = vrcp.f32 %v696_v30  ;;  %v765_v52 = vand.u32 2147483648, %v696_v30  ;;  %v796_v58 = vor.u32 1.1754944e-38, %v795_v48  ;;  %vm794_vm5 = vcmp.eq.f32.partialorder %v793_v47, 8.507059e+37 }
 0x2ca   :  { %v742_v32 = vmul.f32 %v1496_v27, %v741_v29  ;;  %vm759_vm6 = vweird.f32 %v696_v30 }
 0x2cb   :  { %v766_v63 = vor.u32 1.1754944e-38, %v765_v52 }
 0x2cc   :  { %v743_v35 = vadd.f32 %v1496_v27, %v742_v32 }
 0x2cd   :  { %v1498_v57 = vpop.eup %1497 }
 0x2ce   :  { %v747_v37 = vsel %vm746_vm13, %v1496_v27, %v743_v35  ;;  %v785_v38 = vmul.f32 %v1498_v57, %v702_v28  ;;  %v409_v39 = vpop.permute.xlu2 %408  ;;  %vm790_vm15 = vweird.f32 %v1498_v57 }
 0x2cf   :  { %v1500_v40 = vpop.eup %1499  ;;  %v752_v41 = vsel %vm749_vm14, %v751_v55, %v747_v37  ;;  %924 = vmatpush.msrb.mxu0 %v409_v39  ;;  %vm791_vm4 = vmor %vm789_vm2, %vm790_vm15  ;;  %v1022_v39 = vld [vmem:[#allocation14 + $0x8] sm:$0xff] }
 0x2d0   :  { %v786_v42 = vsub.f32 1.0, %v785_v38  ;;  %v755_v43 = vmul.f32 %v1500_v40, %v696_v30  ;;  %v708_v44 = vpop.xlane.xlu0 %707  ;;  %v753_v45 = vmul.f32 %v2147_v36, %v752_v41  ;;  %vm760_vm3 = vweird.f32 %v1500_v40  ;;  %1075 = vmatpush.msra.mxu2 %v1022_v39 }
 0x2d1   :  { %1501 = vrcp.f32 %v708_v44  ;;  %v699_v49 = vpop.xlane.xlu1 %698  ;;  %v763_v36 = vand.u32 2147483647, %v696_v30  ;;  %vm761_vm7 = vmor %vm759_vm6, %vm760_vm3  ;;  %v825_v10 = vand.u32 2147483648, %v708_v44  ;;  %v823_v15 = vand.u32 2147483647, %v708_v44 }
 0x2d2   :  { %v787_v50 = vmul.f32 %v1498_v57, %v786_v42  ;;  %v756_v51 = vsub.f32 1.0, %v755_v43  ;;  %1503 = vrcp.f32 %v699_v49  ;;  %831 = vst.msk [vmem:[%s2314_s21 + $0x10] sm:$0xff] %vm424_vm1, %v753_v45  ;;  %1424 = vmatmul.msk.f32.vlgmr.msrb.gmra.mxu3 %vm424_vm1, %v753_v45  ;;  %v780_v16 = vand.u32 2147483648, %v699_v49 }
 0x2d3   :  { %vm764_vm8 = vcmp.eq.f32.partialorder %v763_v36, 8.507059e+37  ;;  %v778_v17 = vand.u32 2147483647, %v699_v49  ;;  %vm819_vm11 = vweird.f32 %v708_v44  ;;  %v826_v20 = vor.u32 1.1754944e-38, %v825_v10 }
 0x2d4   :  { %v788_v54 = vadd.f32 %v1498_v57, %v787_v50  ;;  %v757_v56 = vmul.f32 %v1500_v40, %v756_v51  ;;  %vm774_vm13 = vweird.f32 %v699_v49  ;;  %vm824_vm14 = vcmp.eq.f32.partialorder %v823_v15, 8.507059e+37 }
 0x2d5   :  { %v781_v22 = vor.u32 1.1754944e-38, %v780_v16  ;;  %vm779_vm2 = vcmp.eq.f32.partialorder %v778_v17, 8.507059e+37 }
 0x2d6   :  { %v792_v59 = vsel %vm791_vm4, %v1498_v57, %v788_v54  ;;  %v758_v60 = vadd.f32 %v1500_v40, %v757_v56 }
 0x2d7   :  { %v1502_v61 = vpop.eup %1501  ;;  %v797_v62 = vsel %vm794_vm5, %v796_v58, %v792_v59 }
 0x2d8   :  { %v1504_v0 = vpop.eup %1503  ;;  %v762_v1 = vsel %vm761_vm7, %v1500_v40, %v758_v60  ;;  %v815_v2 = vmul.f32 %v1502_v61, %v708_v44  ;;  %v705_v3 = vpop.xlane.xlu0 %704  ;;  %v798_v4 = vmul.f32 %v2151_v46, %v797_v62  ;;  %vm820_vm9 = vweird.f32 %v1502_v61  ;;  %v1024_v40 = vld [vmem:[#allocation14 + $0x18] sm:$0xff]  ;;  %v1470_v60 = vld [vmem:[#allocation16] ss:$0 sm:$0xff] }
 0x2d9   :  { %v767_v7 = vsel %vm764_vm8, %v766_v63, %v762_v1  ;;  %v770_v9 = vmul.f32 %v1504_v0, %v699_v49  ;;  %1505 = vrcp.f32 %v705_v3  ;;  %vm775_vm10 = vweird.f32 %v1504_v0  ;;  %vm821_vm12 = vmor %vm819_vm11, %vm820_vm9  ;;  %v857_v37 = vpop.f32.mrf.mxu1 }
 0x2da   :  { %v816_v8 = vsub.f32 1.0, %v815_v2  ;;  %834 = vst.msk [vmem:[%s2314_s21 + $0x28] sm:$0xff] %vm424_vm1, %v798_v4  ;;  %1427 = vmatmul.msk.f32.vlgmr.msrb.gmra.mxu2 %vm424_vm1, %v798_v4  ;;  %v768_v13 = vmul.f32 %v2155_v53, %v767_v7  ;;  %vm776_vm15 = vmor %vm774_vm13, %vm775_vm10  ;;  %v810_v29 = vand.u32 2147483648, %v705_v3  ;;  %v808_v32 = vand.u32 2147483647, %v705_v3  ;;  %v1161_v2 = vld [vmem:[%s2326_s25] sm:$0xff] }
 0x2db   :  { %v771_v12 = vsub.f32 1.0, %v770_v9  ;;  %vm804_vm4 = vweird.f32 %v705_v3 }
 0x2dc   :  { %v817_v14 = vmul.f32 %v1502_v61, %v816_v8  ;;  %832 = vst.msk [vmem:[%s2314_s21 + $0x18] sm:$0xff] %vm424_vm1, %v768_v13  ;;  %1425 = vmatmul.msk.f32.vlgmr.msrb.gmra.mxu0 %vm424_vm1, %v768_v13  ;;  %vm809_vm6 = vcmp.eq.f32.partialorder %v808_v32, 8.507059e+37 }
 0x2dd   :  { %v772_v46 = vmul.f32 %v1504_v0, %v771_v12 }
 0x2de   :  { %v818_v18 = vadd.f32 %v1502_v61, %v817_v14 }
 0x2df   :  { %v1506_v19 = vpop.eup %1505  ;;  %v773_v53 = vadd.f32 %v1504_v0, %v772_v46 }
 0x2e0   :  { %v822_v21 = vsel %vm821_vm12, %v1502_v61, %v818_v18  ;;  %v800_v23 = vmul.f32 %v1506_v19, %v705_v3  ;;  %vm805_vm3 = vweird.f32 %v1506_v19  ;;  %v1891_v18 = vmov 32.0  }
 0x2e1   :  { %v827_v24 = vsel %vm824_vm14, %v826_v20, %v822_v21  ;;  %v777_v25 = vsel %vm776_vm15, %v1504_v0, %v773_v53  ;;  %vm806_vm5 = vmor %vm804_vm4, %vm805_vm3  ;;  %1507 = vrcp.f32 %v1891_v18 }
 0x2e2   :  { %v782_v27 = vsel %vm779_vm2, %v781_v22, %v777_v25  ;;  %v801_v26 = vsub.f32 1.0, %v800_v23  ;;  %v828_v28 = vmul.f32 %v2161_v5, %v827_v24  ;;  %v811_v5 = vor.u32 1.1754944e-38, %v810_v29 }
 0x2e3   :  { %v783_v30 = vmul.f32 %v2163_v6, %v782_v27 }
 0x2e4   :  { %v802_v31 = vmul.f32 %v1506_v19, %v801_v26  ;;  %836 = vst.msk [vmem:[%s2314_s21 + $0x38] sm:$0xff] %vm424_vm1, %v828_v28 }
 0x2e5   :  { %833 = vst.msk [vmem:[%s2314_s21 + $0x20] sm:$0xff] %vm424_vm1, %v783_v30  ;;  %1426 = vmatmul.msk.f32.vlgmr.msra.gmra.mxu1 %vm424_vm1, %v783_v30 }
 0x2e6   :  { %v803_v33 = vadd.f32 %v1506_v19, %v802_v31 }
 0x2e8   :  { %v807_v6 = vsel %vm806_vm5, %v1506_v19, %v803_v33  ;;  %v1508_v19 = vpop.eup %1507 }
 0x2e9   :  { %v812_v34 = vsel %vm809_vm6, %v811_v5, %v807_v6  ;;  %v421_v35 = vpop.permute.xlu1 %420  ;;  %v1173_v20 = vmul.f32 32.0, %v1508_v19  ;;  %v1230_v5 = vld [vmem:[#allocation17 + $0x18] sm:$0xff]  ;;  %v1229_v6 = vld [vmem:[#allocation17 + $0x10] sm:$0xff] }
 0x2ea   :  { %1016 = vmatpush.msra.mxu0 %v421_v35  ;;  %v813_v57 = vmul.f32 %v2174_v11, %v812_v34  ;;  %v1023_v11 = vld [vmem:[#allocation14 + $0x10] sm:$0xff]  ;;  %1253 = vmatpush.msra.mxu1 %v1230_v5  ;;  %v1227_v35 = vld [vmem:[#allocation17] sm:$0xff] }
 0x2eb   :  { %1429 = vmatmul.msk.f32.vlgmr.msra.gmra.mxu0 %vm424_vm1, %v828_v28  ;;  %v419_v55 = vpop.permute.xlu0 %418  ;;  %v1174_v53 = vsub.f32 1.0, %v1173_v20  ;;  %v1228_v34 = vld [vmem:[#allocation17 + $0x8] sm:$0xff] }
 0x2ec   :  { %993 = vmatpush.msra.mxu3 %v419_v55  ;;  %835 = vst.msk [vmem:[%s2314_s21 + $0x30] sm:$0xff] %vm424_vm1, %v813_v57  ;;  %1133 = vmatpush.msrb.mxu0 %v1024_v40 }
 0x2ed   :  { %1430 = vmatmul.msk.f32.vlgmr.msrb.gmra.mxu1 %vm424_vm1, %v857_v37  ;;  %1428 = vmatmul.msk.f32.vlgmr.msra.gmra.mxu3 %vm424_vm1, %v813_v57  ;;  %v1175_v21 = vmul.f32 %v1508_v19, %v1174_v53 }
 0x2ee   :  { %1104 = vmatpush.msrb.mxu3 %v1023_v11  ;;  %1254 = vmatpush.msra.mxu1 %v1229_v6 }
 0x2ef   :  { %v880_v38 = vpop.f32.mrf.mxu2  ;;  %v1176_v22 = vadd.f32 %v1508_v19, %v1175_v21 }
 0x2f0   :  { %1255 = vmatpush.msra.mxu1 %v1228_v34 }
 0x2f2   :  { %1256 = vmatpush.msra.mxu1 %v1227_v35 }
 0x2f5   :  { %1431 = vmatmul.msk.f32.gmra.mxu1 %vm424_vm1, %v880_v38 }
 0x355   :  { %v903_v41 = vpop.f32.mrf.mxu3 }
 0x356   :  { %1432 = vmatmul.msk.f32.vlgmr.msra.gmra.mxu2 %vm424_vm1, %v903_v41 }
 0x359   :  { %v926_v42 = vpop.f32.mrf.mxu0 }
 0x35d   :  { %v972_v44 = vpop.f32.mrf.mxu2 }
 0x35e   :  { %1433 = vmatmul.msk.f32.gmra.mxu2 %vm424_vm1, %v926_v42 }
 0x362   :  { %v949_v43 = vpop.f32.mrf.mxu1 }
 0x363   :  { %1434 = vmatmul.msk.f32.vlgmr.msrb.gmra.mxu3 %vm424_vm1, %v949_v43 }
 0x368   :  { %v1018_v47 = vpop.f32.mrf.mxu0 }
 0x36a   :  { %v1048_v49 = vpop.f32.mrf.mxu1 }
 0x36b   :  { %1435 = vmatmul.msk.f32.gmra.mxu3 %vm424_vm1, %v972_v44  ;;  %v1141_v52 = vsel %vm278_vm0, %v1048_v49, 0.0  ;;  %v2258_v49 = vld [vmem:[%s2307_s14] ss:$0 sm:$0xff]  ;;  %s1892_s14 = smov [#allocation23]  }
 0x370   :  { %v995_v45 = vpop.f32.mrf.mxu3 }
 0x371   :  { %1436 = vmatmul.msk.f32.vlgmr.msrb.gmra.mxu0 %vm424_vm1, %v995_v45 }
 0x372   :  { %v1051_v62 = vpop.f32.mrf.mxu1 }
 0x373   :  { %v1148_v4 = vsel %vm278_vm0, %v1051_v62, 0.0 }
 0x379   :  { %1437 = vmatmul.msk.f32.gmra.mxu0 %vm424_vm1, %v1018_v47  ;;  %vm1177_vm1 = vweird.f32 %v1508_v19 }
 0x37a   :  { %v2247_v23 = vsel %vm1177_vm1, %v1508_v19, %v1176_v22 }
 0x3d9   :  { %v1077_v48 = vpop.f32.mrf.mxu2 }
 0x3da   :  { %v1142_v51 = vsel %vm278_vm0, %v1077_v48, 0.0 }
 0x3db   :  { %v1143_v56 = vadd.f32 %v1142_v51, %v1141_v52 }
 0x3e1   :  { %v1080_v36 = vpop.f32.mrf.mxu2 }
 0x3e2   :  { %v1149_v1 = vsel %vm278_vm0, %v1080_v36, 0.0 }
 0x3e3   :  { %v1150_v9 = vadd.f32 %v1149_v1, %v1148_v4  ;;  %v1285_v1 = vld [vmem:[#allocation20 + $0x18] sm:$0xff]  ;;  %v1282_v4 = vld [vmem:[#allocation20] sm:$0xff] }
 0x3e4   :  { %1308 = vmatpush.msrb.mxu2 %v1285_v1 }
 0x3e6   :  { %v1106_v50 = vpop.f32.mrf.mxu3 }
 0x3e7   :  { %v1144_v54 = vsel %vm278_vm0, %v1106_v50, 0.0 }
 0x3e8   :  { %v1145_v58 = vadd.f32 %v1144_v54, %v1143_v56  ;;  %v2263_v54 = vld [vmem:[%s2308_s15] ss:$0 sm:$0xff]  ;;  %s1375_s15 = sshll.u32 %s1892_s14, 4  ;;  %s1376_s15 = int_to_ptr.vmem [resolvable:$true] %s1375_s15 }
 0x3ee   :  { %v1135_v59 = vpop.f32.mrf.mxu0  ;;  %v1109_v63 = vpop.f32.mrf.mxu3 }
 0x3ef   :  { %v1146_v61 = vsel %vm278_vm0, %v1135_v59, 0.0  ;;  %v1151_v7 = vsel %vm278_vm0, %v1109_v63, 0.0 }
 0x3f0   :  { %v1147_v0 = vadd.f32 %v1146_v61, %v1145_v58  ;;  %v1152_v10 = vadd.f32 %v1151_v7, %v1150_v9  ;;  %v1473_v7 = vld [vmem:[#allocation19] ss:$0 sm:$0xff] }
 0x3f2   :  { %v1159_v3 = vadd.f32 %v1470_v60, %v1147_v0 }
 0x3f4   :  { %v1162_v8 = vadd.f32 %v1161_v2, %v1159_v3  ;;  %v1283_v3 = vld [vmem:[#allocation20 + $0x8] sm:$0xff] }
 0x3f6   :  { %v1138_v12 = vpop.f32.mrf.mxu0  ;;  %v1166_v13 = vsel %vm278_vm0, %v1162_v8, 0.0 }
 0x3f7   :  { %v1153_v14 = vsel %vm278_vm0, %v1138_v12, 0.0  ;;  %1167 = vadd.xlane.f32.xlu0 %v1166_v13 }
 0x3f8   :  { %v1154_v15 = vadd.f32 %v1153_v14, %v1152_v10 }
 0x3fa   :  { %v1160_v16 = vadd.f32 %v1470_v60, %v1154_v15 }
 0x3fc   :  { %v1163_v46 = vadd.f32 %v1161_v2, %v1160_v16  ;;  %v1284_v2 = vld [vmem:[#allocation20 + $0x10] sm:$0xff] }
 0x3fd   :  { %1309 = vmatpush.msrb.mxu2 %v1284_v2 }
 0x3fe   :  { %v1169_v17 = vsel %vm278_vm0, %v1163_v46, 0.0 }
 0x3ff   :  { %1170 = vadd.xlane.f32.xlu2 %v1169_v17  ;;  %1310 = vmatpush.msrb.mxu2 %v1283_v3 }
 0x401   :  { %1311 = vmatpush.msrb.mxu2 %v1282_v4 }
 0x46a   :  { %v1168_v24 = vpop.xlane.xlu0 %1167 }
 0x46b   :  { %v1179_v25 = vmul.f32 %v2247_v23, %v1168_v24 }
 0x46d   :  { %v1181_v27 = vsub.f32 %v1162_v8, %v1179_v25 }
 0x46f   :  { %v1183_v26 = vmul.f32 %v1181_v27, %v1181_v27 }
 0x471   :  { %v1185_v28 = vsel %vm278_vm0, %v1183_v26, 0.0 }
 0x472   :  { %1186 = vadd.xlane.f32.xlu1 %v1185_v28  ;;  %v1171_v29 = vpop.xlane.xlu2 %1170 }
 0x473   :  { %v1180_v30 = vmul.f32 %v2247_v23, %v1171_v29 }
 0x475   :  { %v1182_v31 = vsub.f32 %v1163_v46, %v1180_v30  ;;  %v1474_v30 = vld [vmem:[#allocation22] ss:$0 sm:$0xff] }
 0x477   :  { %v1184_v32 = vmul.f32 %v1182_v31, %v1182_v31 }
 0x479   :  { %v1188_v33 = vsel %vm278_vm0, %v1184_v32, 0.0 }
 0x47a   :  { %1189 = vadd.xlane.f32.xlu0 %v1188_v33 }
 0x4e5   :  { %v1187_v57 = vpop.xlane.xlu1 %1186 }
 0x4e6   :  { %v1191_v55 = vmul.f32 %v1187_v57, %v2247_v23 }
 0x4e8   :  { %v1193_v37 = vadd.f32 1e-05, %v1191_v55 }
 0x4ea   :  { %1509 = vrsqrt.f32 %v1193_v37  ;;  %vm1201_vm8 = vweird.f32 %v1193_v37 }
 0x4ed   :  { %v1190_v38 = vpop.xlane.xlu0 %1189 }
 0x4ee   :  { %v1192_v39 = vmul.f32 %v1190_v38, %v2247_v23 }
 0x4f0   :  { %v1510_v11 = vpop.eup %1509  ;;  %v1194_v40 = vadd.f32 1e-05, %v1192_v39 }
 0x4f1   :  { %v1196_v41 = vmul.f32 %v1510_v11, %v1193_v37  ;;  %vm1202_vm7 = vweird.f32 %v1510_v11 }
 0x4f2   :  { %1511 = vrsqrt.f32 %v1194_v40  ;;  %vm1203_vm9 = vmor %vm1201_vm8, %vm1202_vm7  ;;  %vm1211_vm11 = vweird.f32 %v1194_v40 }
 0x4f3   :  { %v1197_v42 = vmul.f32 %v1510_v11, %v1196_v41 }
 0x4f5   :  { %v1198_v43 = vmul.f32 0.5, %v1197_v42 }
 0x4f7   :  { %v1199_v44 = vsub.f32 1.5, %v1198_v43 }
 0x4f8   :  { %v1512_v45 = vpop.eup %1511 }
 0x4f9   :  { %v1200_v47 = vmul.f32 %v1510_v11, %v1199_v44  ;;  %v1206_v48 = vmul.f32 %v1512_v45, %v1194_v40  ;;  %vm1212_vm10 = vweird.f32 %v1512_v45 }
 0x4fa   :  { %vm1213_vm12 = vmor %vm1211_vm11, %vm1212_vm10 }
 0x4fb   :  { %v1204_v50 = vsel %vm1203_vm9, %v1510_v11, %v1200_v47  ;;  %v1207_v51 = vmul.f32 %v1512_v45, %v1206_v48 }
 0x4fc   :  { %v1215_v52 = vmul.f32 %v1204_v50, %v1181_v27 }
 0x4fd   :  { %v1208_v56 = vmul.f32 0.5, %v1207_v51 }
 0x4fe   :  { %v1220_v36 = vmul.f32 %v2258_v49, %v1215_v52 }
 0x4ff   :  { %v1209_v58 = vsub.f32 1.5, %v1208_v56 }
 0x500   :  { %v1225_v59 = vadd.f32 %v2263_v54, %v1220_v36 }
 0x501   :  { %v1210_v60 = vmul.f32 %v1512_v45, %v1209_v58 }
 0x502   :  { %1438 = vmatmul.msk.f32.vlgmr.msra.gmra.mxu1 %vm278_vm0, %v1225_v59 }
 0x503   :  { %v1214_v61 = vsel %vm1213_vm12, %v1512_v45, %v1210_v60 }
 0x504   :  { %v1216_v62 = vmul.f32 %v1214_v61, %v1182_v31 }
 0x506   :  { %v1221_v63 = vmul.f32 %v2258_v49, %v1216_v62 }
 0x508   :  { %v1226_v0 = vadd.f32 %v2263_v54, %v1221_v63 }
 0x50a   :  { %1439 = vmatmul.msk.f32.gmra.mxu1 %vm278_vm0, %v1226_v0 }
 0x57f   :  { %v1258_v9 = vpop.f32.mrf.mxu1 }
 0x580   :  { %v1259_v8 = vadd.f32 %v1473_v7, %v1258_v9 }
 0x582   :  { %v1266_v10 = vmul.f32 0.044715, %v1259_v8  ;;  %v1264_v22 = vmul.f32 0.5, %v1259_v8 }
 0x584   :  { %v1268_v12 = vmul.f32 %v1266_v10, %v1259_v8 }
 0x586   :  { %v1270_v13 = vmul.f32 %v1268_v12, %v1259_v8 }
 0x587   :  { %v1261_v14 = vpop.f32.mrf.mxu1 }
 0x588   :  { %v1272_v15 = vadd.f32 %v1270_v13, %v1259_v8  ;;  %v1262_v16 = vadd.f32 %v1473_v7, %v1261_v14 }
 0x58a   :  { %v1274_v46 = vmul.f32 0.7978846, %v1272_v15  ;;  %v1267_v17 = vmul.f32 0.044715, %v1262_v16  ;;  %v1265_v26 = vmul.f32 0.5, %v1262_v16 }
 0x58c   :  { %1513 = vtanh.f32 %v1274_v46  ;;  %v1269_v18 = vmul.f32 %v1267_v17, %v1262_v16 }
 0x58e   :  { %v1271_v19 = vmul.f32 %v1269_v18, %v1262_v16 }
 0x590   :  { %v1273_v20 = vadd.f32 %v1271_v19, %v1262_v16 }
 0x592   :  { %v1514_v53 = vpop.eup %1513  ;;  %v1275_v21 = vmul.f32 0.7978846, %v1273_v20 }
 0x593   :  { %v1278_v24 = vadd.f32 1.0, %v1514_v53 }
 0x594   :  { %1515 = vtanh.f32 %v1275_v21 }
 0x595   :  { %v1280_v25 = vmul.f32 %v1278_v24, %v1264_v22 }
 0x597   :  { %1440 = vmatmul.msk.f32.vlgmr.msrb.gmra.mxu2 %vm278_vm0, %v1280_v25 }
 0x59a   :  { %v1516_v27 = vpop.eup %1515 }
 0x59b   :  { %v1279_v28 = vadd.f32 1.0, %v1516_v27 }
 0x59d   :  { %v1281_v29 = vmul.f32 %v1279_v28, %v1265_v26 }
 0x59f   :  { %1441 = vmatmul.msk.f32.gmra.mxu2 %vm278_vm0, %v1281_v29 }
 0x61a   :  { %v1313_v31 = vpop.f32.mrf.mxu2 }
 0x61b   :  { %v1314_v32 = vadd.f32 %v1474_v30, %v1313_v31 }
 0x61d   :  { %v1319_v33 = vadd.f32 %v1314_v32, %v1225_v59 }
 0x61f   :  { %v1321_v5 = vsel %vm278_vm0, %v1319_v33, 0.0 }
 0x620   :  { %1322 = vadd.xlane.f32.xlu2 %v1321_v5 }
 0x622   :  { %v1316_v6 = vpop.f32.mrf.mxu2 }
 0x623   :  { %v1317_v34 = vadd.f32 %v1474_v30, %v1316_v6 }
 0x625   :  { %v1320_v35 = vadd.f32 %v1317_v34, %v1226_v0 }
 0x627   :  { %v1324_v57 = vsel %vm278_vm0, %v1320_v35, 0.0 }
 0x628   :  { %1325 = vadd.xlane.f32.xlu1 %v1324_v57 }
 0x693   :  { %v1323_v55 = vpop.xlane.xlu2 %1322 }
 0x694   :  { %v1327_v37 = vmul.f32 %v1323_v55, %v2247_v23 }
 0x696   :  { %v1329_v38 = vsub.f32 %v1319_v33, %v1327_v37 }
 0x698   :  { %v1331_v39 = vmul.f32 %v1329_v38, %v1329_v38 }
 0x69a   :  { %v1333_v11 = vsel %vm278_vm0, %v1331_v39, 0.0 }
 0x69b   :  { %v1326_v40 = vpop.xlane.xlu1 %1325  ;;  %1334 = vadd.xlane.f32.xlu0 %v1333_v11 }
 0x69c   :  { %v1328_v41 = vmul.f32 %v1326_v40, %v2247_v23 }
 0x69e   :  { %v1330_v42 = vsub.f32 %v1320_v35, %v1328_v41 }
 0x6a0   :  { %v1332_v43 = vmul.f32 %v1330_v42, %v1330_v42 }
 0x6a2   :  { %v1336_v44 = vsel %vm278_vm0, %v1332_v43, 0.0 }
 0x6a3   :  { %1337 = vadd.xlane.f32.xlu2 %v1336_v44 }
 0x70e   :  { %v1335_v45 = vpop.xlane.xlu0 %1334 }
 0x70f   :  { %v1339_v47 = vmul.f32 %v1335_v45, %v2247_v23 }
 0x711   :  { %v1341_v48 = vadd.f32 1e-05, %v1339_v47 }
 0x713   :  { %1517 = vrsqrt.f32 %v1341_v48  ;;  %vm1349_vm14 = vweird.f32 %v1341_v48 }
 0x716   :  { %v1338_v50 = vpop.xlane.xlu2 %1337 }
 0x717   :  { %v1340_v51 = vmul.f32 %v1338_v50, %v2247_v23 }
 0x719   :  { %v1518_v52 = vpop.eup %1517  ;;  %v1342_v56 = vadd.f32 1e-05, %v1340_v51 }
 0x71a   :  { %v1344_v36 = vmul.f32 %v1518_v52, %v1341_v48  ;;  %vm1350_vm13 = vweird.f32 %v1518_v52 }
 0x71b   :  { %1519 = vrsqrt.f32 %v1342_v56  ;;  %vm1351_vm15 = vmor %vm1349_vm14, %vm1350_vm13  ;;  %vm1359_vm3 = vweird.f32 %v1342_v56 }
 0x71c   :  { %v1345_v58 = vmul.f32 %v1518_v52, %v1344_v36 }
 0x71e   :  { %v1346_v59 = vmul.f32 0.5, %v1345_v58 }
 0x720   :  { %v1347_v60 = vsub.f32 1.5, %v1346_v59 }
 0x721   :  { %v1520_v61 = vpop.eup %1519 }
 0x722   :  { %v1348_v62 = vmul.f32 %v1518_v52, %v1347_v60  ;;  %v1354_v63 = vmul.f32 %v1520_v61, %v1342_v56  ;;  %vm1360_vm2 = vweird.f32 %v1520_v61 }
 0x723   :  { %vm1361_vm4 = vmor %vm1359_vm3, %vm1360_vm2 }
 0x724   :  { %v1352_v0 = vsel %vm1351_vm15, %v1518_v52, %v1348_v62  ;;  %v1355_v1 = vmul.f32 %v1520_v61, %v1354_v63 }
 0x725   :  { %v1363_v2 = vmul.f32 %v1352_v0, %v1329_v38 }
 0x726   :  { %v1356_v3 = vmul.f32 0.5, %v1355_v1 }
 0x727   :  { %v1365_v4 = vmul.f32 %v2258_v49, %v1363_v2 }
 0x728   :  { %v1357_v23 = vsub.f32 1.5, %v1356_v3 }
 0x729   :  { %v1367_v7 = vadd.f32 %v2263_v54, %v1365_v4 }
 0x72a   :  { %v1358_v9 = vmul.f32 %v1520_v61, %v1357_v23 }
 0x72b   :  { %1369 = vst.msk [vmem:[#allocation23] sm:$0xff] %vm278_vm0, %v1367_v7 }
 0x72c   :  { %v1362_v8 = vsel %vm1361_vm4, %v1520_v61, %v1358_v9 }
 0x72d   :  { %v1364_v10 = vmul.f32 %v1362_v8, %v1330_v42 }
 0x72f   :  { %v1366_v12 = vmul.f32 %v2258_v49, %v1364_v10 }
 0x731   :  { %v1368_v13 = vadd.f32 %v2263_v54, %v1366_v12 }
 0x733   :  { %1370 = vst.msk [vmem:[#allocation23 + $0x8] sm:$0xff] %vm278_vm0, %v1368_v13 }
 0x734   :  { %1383 = dma.vmem_to_hbm [thread:$0]  %s1376_s15, 256, %s1378_s8, [#allocation4], %s1874_s30, %s1874_s30, %s1875_s5  }
 0x735   :  { %1871 = dma.done.wait [#allocation4], 256  }
 0x736   :  { %1872 = vsyncadd [#allocation4], 4294967040 }
 0x737   :  { %1392 = vsyncpa [#allocation3], 1 }
 0x738   :  { %1393 = vsyncpa [#allocation6], 1 }
 0x739   :  { %1394 = vsyncpa [#allocation9], 1 }
 0x73a   :  { %1395 = vsyncpa [#allocation12], 1 }
 0x73b   :  { %1396 = vsyncpa [#allocation15], 1 }
 0x73c   :  { %1397 = vsyncpa [#allocation18], 1 }
 0x73d   :  { %1398 = vsyncpa [#allocation21], 1 }
 0x73e   :  { %1399 = vsyncpa [#allocation4], 1 }

</bundles_post_ra>
